<compile_context>
chip_gen: v7x
topology: tpu7x:2x2x1
jax: 0.10.0
libtpu: 0.0.40
codegen_flags: <defaults>
</compile_context>

<pallas_src>
import functools

import jax
import jax.numpy as jnp
from jax.experimental import pallas as pl
from jax.experimental.pallas import tpu as pltpu


def calc_same_padding(kernel_size):
    pad = kernel_size // 2
    return (pad, pad - (kernel_size + 1) % 2)


def _round_up(x, m):
    return (x + m - 1) // m * m


_HALO = 16  # halo rows fetched per side; multiple of 8; covers kernel_size <= 33


def _sigmoid(x):
    # exp on EUP + approx reciprocal on EUP -> keeps the divide off the VALU.
    return pl.reciprocal(1.0 + jnp.exp(-x), approx=True)


def _conformer_kernel(x_ref, xl_ref, xr_ref, gamma_ref, beta_ref,
                      w1o_ref, b1o_ref, w1g_ref, b1g_ref,
                      wdw_ref, bdw_ref, w2_ref, b2_ref,
                      o_ref, gp_ref, *, pad_l, seq_len, tile_t, inv_dim, eps):
    t = pl.program_id(1)
    K = wdw_ref.shape[0]

    # Assemble current tile plus 16-row left/right halos.
    # Row j of `x` corresponds to absolute sequence position t*tile_t - HALO + j.
    x = jnp.concatenate(
        [xl_ref[0].astype(jnp.float32),
         x_ref[0].astype(jnp.float32),
         xr_ref[0].astype(jnp.float32)], axis=0)            # (tile_t + 2*HALO, dim_p)

    # ---- LayerNorm over the REAL channel dim (padded lanes are zero), one pass ----
    mean = jnp.sum(x, axis=-1, keepdims=True) * inv_dim
    ex2 = jnp.sum(x * x, axis=-1, keepdims=True) * inv_dim
    var = ex2 - mean * mean
    xn = (x - mean) * jax.lax.rsqrt(var + eps)
    xn = xn * gamma_ref[...] + beta_ref[...]                # padded lanes -> 0 (gamma/beta padded 0)

    # ---- pointwise Conv1d #1, split into out/gate halves (no lane slicing) + GLU ----
    xn_b = xn.astype(jnp.bfloat16)
    y_out = jnp.dot(xn_b, w1o_ref[...], preferred_element_type=jnp.float32) + b1o_ref[...]
    y_gate = jnp.dot(xn_b, w1g_ref[...], preferred_element_type=jnp.float32) + b1g_ref[...]
    g = y_out * _sigmoid(y_gate)                            # (tile_t + 2*HALO, inner_p)

    # ---- zero rows outside [0, seq_len): this IS the depthwise conv's zero padding
    #      (and also kills clamped halo blocks at the sequence edges + tail padding).
    rows = jax.lax.broadcasted_iota(jnp.int32, (g.shape[0], 1), 0)
    pos = t * tile_t - _HALO + rows
    g = jnp.where((pos >= 0) & (pos < seq_len), g, 0.0)

    # Single sublane-aligned full-slab store (scratch never needs zeroing).
    gp_ref[...] = g

    # ---- depthwise Conv1d: K static taps over the padded-g slab ----
    acc = jnp.zeros((tile_t, g.shape[1]), jnp.float32)
    for k in range(K):
        acc = acc + gp_ref[pl.ds(_HALO - pad_l + k, tile_t), :] * wdw_ref[k, :]
    acc = acc + bdw_ref[...]

    # ---- Swish ----
    z = acc * _sigmoid(acc)

    # ---- pointwise Conv1d #2 ----
    o = jnp.dot(z.astype(jnp.bfloat16), w2_ref[...],
                preferred_element_type=jnp.float32) + b2_ref[...]

    # Dropout(p=0.0) is identity at inference.
    o_ref[0] = o.astype(o_ref.dtype)


def conformer_conv_module(x, params, *, kernel_size=31, eps=1e-5, tile_t=128,
                          vmem_limit_bytes=32 * 1024 * 1024):
    """x: (B, T, dim) float32. params in channels-last layout. Returns (B, T, dim)."""
    B, T, dim = x.shape
    gamma, beta, w1, b1, wdw, bdw, w2, b2 = params
    inner = wdw.shape[1]
    pad_l, pad_r = calc_same_padding(kernel_size)
    assert pad_l <= _HALO and pad_r <= _HALO, "kernel_size > 33 needs a larger halo"

    # Lane-dense channel padding (output last dim multiple of 128 is the big lever).
    dim_p = _round_up(dim, 128)
    inner_p = _round_up(inner, 128)

    # T tiling; tile_t must be a multiple of _HALO so halo blocks index cleanly.
    tile_t = max(_HALO, _round_up(min(tile_t, _round_up(T, _HALO)), _HALO))
    nt = pl.cdiv(T, tile_t)
    T_r = nt * tile_t
    n16 = T_r // _HALO          # number of 16-row blocks along T
    R = tile_t // _HALO

    f32 = jnp.float32
    x_p = jnp.pad(x.astype(f32), ((0, 0), (0, T_r - T), (0, dim_p - dim)))

    def pad2(a, r, c):
        a = a.astype(f32)
        return jnp.pad(a, ((0, r - a.shape[0]), (0, c - a.shape[1])))

    gamma_p = pad2(gamma, 1, dim_p)
    beta_p = pad2(beta, 1, dim_p)
    w1o = pad2(w1[:, :inner], dim_p, inner_p).astype(jnp.bfloat16)   # bf16 MXU operands
    w1g = pad2(w1[:, inner:], dim_p, inner_p).astype(jnp.bfloat16)
    b1o = pad2(b1[:, :inner], 1, inner_p)
    b1g = pad2(b1[:, inner:], 1, inner_p)
    wdw_p = pad2(wdw, kernel_size, inner_p)
    bdw_p = pad2(bdw, 1, inner_p)
    w2_p = pad2(w2, inner_p, dim_p).astype(jnp.bfloat16)
    b2_p = pad2(b2, 1, dim_p)

    kernel = functools.partial(_conformer_kernel, pad_l=pad_l, seq_len=T,
                               tile_t=tile_t, inv_dim=1.0 / dim, eps=eps)

    full = lambda shape: pl.BlockSpec(shape, lambda b, t: (0,) * len(shape))

    out = pl.pallas_call(
        kernel,
        out_shape=jax.ShapeDtypeStruct((B, T_r, dim_p), x.dtype),
        grid_spec=pltpu.PrefetchScalarGridSpec(
            num_scalar_prefetch=0,
            grid=(B, nt),
            in_specs=[
                # current T tile
                pl.BlockSpec((1, tile_t, dim_p), lambda b, t: (b, t, 0)),
                # 16-row left halo (clamped at t==0; masked in-kernel)
                pl.BlockSpec((1, _HALO, dim_p),
                             lambda b, t: (b, jnp.maximum(t * R - 1, 0), 0)),
                # 16-row right halo (clamped at last tile; masked in-kernel)
                pl.BlockSpec((1, _HALO, dim_p),
                             lambda b, t: (b, jnp.minimum((t + 1) * R, n16 - 1), 0)),
                full((1, dim_p)),            # gamma
                full((1, dim_p)),            # beta
                full((dim_p, inner_p)),      # w1_out (bf16)
                full((1, inner_p)),          # b1_out
                full((dim_p, inner_p)),      # w1_gate (bf16)
                full((1, inner_p)),          # b1_gate
                full((kernel_size, inner_p)),  # depthwise weight
                full((1, inner_p)),          # depthwise bias
                full((inner_p, dim_p)),      # w2 (bf16)
                full((1, dim_p)),            # b2
            ],
            out_specs=pl.BlockSpec((1, tile_t, dim_p), lambda b, t: (b, t, 0)),
            scratch_shapes=[pltpu.VMEM((tile_t + 2 * _HALO, inner_p), jnp.float32)],
        ),
        compiler_params=pltpu.CompilerParams(
            dimension_semantics=("parallel", "parallel"),
            vmem_limit_bytes=vmem_limit_bytes),
    )(x_p, x_p, x_p, gamma_p, beta_p, w1o, b1o, w1g, b1g, wdw_p, bdw_p, w2_p, b2_p)

    return out[:, :T, :dim]


def _reference(x, params, *, kernel_size=31, eps=1e-5):
    """Pure-JAX f32 reference mirroring the PyTorch module semantics."""
    gamma, beta, w1, b1, wdw, bdw, w2, b2 = params
    inner = wdw.shape[1]
    pad_l, pad_r = calc_same_padding(kernel_size)
    mean = jnp.mean(x, axis=-1, keepdims=True)
    var = jnp.mean((x - mean) ** 2, axis=-1, keepdims=True)
    xn = (x - mean) / jnp.sqrt(var + eps) * gamma[0] + beta[0]
    y = xn @ w1 + b1[0]
    g = y[..., :inner] * jax.nn.sigmoid(y[..., inner:])
    gp = jnp.pad(g, ((0, 0), (pad_l, pad_r), (0, 0)))
    T = x.shape[1]
    acc = sum(gp[:, k:k + T, :] * wdw[k] for k in range(kernel_size)) + bdw[0]
    z = acc * jax.nn.sigmoid(acc)
    return z @ w2 + b2[0]


if __name__ == "__main__":
    B, T, dim = 2, 40, 32          # T=40 with tile_t=16 -> 3 tiles + tail masking
    expansion_factor = 2
    kernel_size = 31
    inner = dim * expansion_factor

    key = jax.random.PRNGKey(0)
    ks = jax.random.split(key, 9)
    x = jax.random.normal(ks[0], (B, T, dim), jnp.float32)

    gamma = 1.0 + 0.1 * jax.random.normal(ks[7], (1, dim), jnp.float32)
    beta = 0.1 * jax.random.normal(ks[8], (1, dim), jnp.float32)
    w1 = 0.1 * jax.random.normal(ks[1], (dim, 2 * inner), jnp.float32)
    b1 = 0.1 * jax.random.normal(ks[2], (1, 2 * inner), jnp.float32)
    wdw = 0.1 * jax.random.normal(ks[3], (kernel_size, inner), jnp.float32)
    bdw = 0.1 * jax.random.normal(ks[4], (1, inner), jnp.float32)
    w2 = 0.1 * jax.random.normal(ks[5], (inner, dim), jnp.float32)
    b2 = 0.1 * jax.random.normal(ks[6], (1, dim), jnp.float32)
    params = (gamma, beta, w1, b1, wdw, bdw, w2, b2)

    out = conformer_conv_module(x, params, kernel_size=kernel_size, tile_t=16)
    out = jax.block_until_ready(out)

    ref = _reference(x, params, kernel_size=kernel_size)
    assert out.shape == (B, T, dim)
    max_err = float(jnp.max(jnp.abs(out - ref)))
    # bf16 MXU operands + approx-reciprocal sigmoids -> relaxed tolerance.
    assert jnp.allclose(out, ref, atol=2e-2, rtol=2e-2), f"mismatch vs reference: {max_err}"
    print("KERNEL_OK")
</pallas_src>

<mosaic_0001>
module attributes {stable_mosaic.version = 11 : i64} {
  func.func @_conformer_kernel(%arg0: i32, %arg1: i32, %arg2: memref<1x16x128xf32, #tpu.memory_space<vmem>>, %arg3: memref<1x16x128xf32, #tpu.memory_space<vmem>>, %arg4: memref<1x16x128xf32, #tpu.memory_space<vmem>>, %arg5: memref<1x128xf32, #tpu.memory_space<vmem>>, %arg6: memref<1x128xf32, #tpu.memory_space<vmem>>, %arg7: memref<128x128xbf16, #tpu.memory_space<vmem>>, %arg8: memref<1x128xf32, #tpu.memory_space<vmem>>, %arg9: memref<128x128xbf16, #tpu.memory_space<vmem>>, %arg10: memref<1x128xf32, #tpu.memory_space<vmem>>, %arg11: memref<31x128xf32, #tpu.memory_space<vmem>>, %arg12: memref<1x128xf32, #tpu.memory_space<vmem>>, %arg13: memref<128x128xbf16, #tpu.memory_space<vmem>>, %arg14: memref<1x128xf32, #tpu.memory_space<vmem>>, %arg15: memref<1x16x128xf32, #tpu.memory_space<vmem>>, %arg16: memref<48x128xf32, #tpu.memory_space<vmem>>) attributes {dimension_semantics = [#tpu.dimension_semantics<parallel>, #tpu.dimension_semantics<parallel>], iteration_bounds = array<i64: 2, 3>, scalar_prefetch = 0 : i64, scratch_operands = 1 : i64, tpu.core_type = #tpu.core_type<tc>, window_params = [{transform_indices = @transform_0, window_bounds = array<i64: 1, 16, 128>}, {transform_indices = @transform_1, window_bounds = array<i64: 1, 16, 128>}, {transform_indices = @transform_2, window_bounds = array<i64: 1, 16, 128>}, {pipeline_mode = #tpu.pipeline_mode<synchronous>, transform_indices = @transform_3, window_bounds = array<i64: 1, 128>}, {pipeline_mode = #tpu.pipeline_mode<synchronous>, transform_indices = @transform_4, window_bounds = array<i64: 1, 128>}, {pipeline_mode = #tpu.pipeline_mode<synchronous>, transform_indices = @transform_5, window_bounds = array<i64: 128, 128>}, {pipeline_mode = #tpu.pipeline_mode<synchronous>, transform_indices = @transform_6, window_bounds = array<i64: 1, 128>}, {pipeline_mode = #tpu.pipeline_mode<synchronous>, transform_indices = @transform_7, window_bounds = array<i64: 128, 128>}, {pipeline_mode = #tpu.pipeline_mode<synchronous>, transform_indices = @transform_8, window_bounds = array<i64: 1, 128>}, {pipeline_mode = #tpu.pipeline_mode<synchronous>, transform_indices = @transform_9, window_bounds = array<i64: 31, 128>}, {pipeline_mode = #tpu.pipeline_mode<synchronous>, transform_indices = @transform_10, window_bounds = array<i64: 1, 128>}, {pipeline_mode = #tpu.pipeline_mode<synchronous>, transform_indices = @transform_11, window_bounds = array<i64: 128, 128>}, {pipeline_mode = #tpu.pipeline_mode<synchronous>, transform_indices = @transform_12, window_bounds = array<i64: 1, 128>}, {transform_indices = @transform_13, window_bounds = array<i64: 1, 16, 128>}]} {
    %c0 = arith.constant 0 : index
    %c0_0 = arith.constant 0 : index
    %c0_1 = arith.constant 0 : index
    %0 = vector.load %arg3[%c0, %c0_0, %c0_1] : memref<1x16x128xf32, #tpu.memory_space<vmem>>, vector<1x16x128xf32>
    %1 = vector.shape_cast %0 : vector<1x16x128xf32> to vector<16x128xf32>
    %c0_2 = arith.constant 0 : index
    %c0_3 = arith.constant 0 : index
    %c0_4 = arith.constant 0 : index
    %2 = vector.load %arg2[%c0_2, %c0_3, %c0_4] : memref<1x16x128xf32, #tpu.memory_space<vmem>>, vector<1x16x128xf32>
    %3 = vector.shape_cast %2 : vector<1x16x128xf32> to vector<16x128xf32>
    %c0_5 = arith.constant 0 : index
    %c0_6 = arith.constant 0 : index
    %c0_7 = arith.constant 0 : index
    %4 = vector.load %arg4[%c0_5, %c0_6, %c0_7] : memref<1x16x128xf32, #tpu.memory_space<vmem>>, vector<1x16x128xf32>
    %5 = vector.shape_cast %4 : vector<1x16x128xf32> to vector<16x128xf32>
    %6 = tpu.concatenate %1, %3, %5 in 0 : vector<16x128xf32>, vector<16x128xf32>, vector<16x128xf32> -> vector<48x128xf32>
    %cst = arith.constant dense<0.000000e+00> : vector<48xf32>
    %7 = vector.multi_reduction <add>, %6, %cst [1] : vector<48x128xf32> to vector<48xf32>
    %8 = vector.shape_cast %7 : vector<48xf32> to vector<48x1xf32>
    %cst_8 = arith.constant 3.125000e-02 : f32
    %9 = vector.broadcast %cst_8 : f32 to vector<48x1xf32>
    %10 = arith.mulf %8, %9 : vector<48x1xf32>
    %11 = arith.mulf %6, %6 : vector<48x128xf32>
    %cst_9 = arith.constant dense<0.000000e+00> : vector<48xf32>
    %12 = vector.multi_reduction <add>, %11, %cst_9 [1] : vector<48x128xf32> to vector<48xf32>
    %13 = vector.shape_cast %12 : vector<48xf32> to vector<48x1xf32>
    %cst_10 = arith.constant 3.125000e-02 : f32
    %14 = vector.broadcast %cst_10 : f32 to vector<48x1xf32>
    %15 = arith.mulf %13, %14 : vector<48x1xf32>
    %16 = arith.mulf %10, %10 : vector<48x1xf32>
    %17 = arith.subf %15, %16 : vector<48x1xf32>
    %18 = vector.broadcast %10 : vector<48x1xf32> to vector<48x128xf32>
    %19 = arith.subf %6, %18 : vector<48x128xf32>
    %cst_11 = arith.constant 9.99999974E-6 : f32
    %20 = vector.broadcast %cst_11 : f32 to vector<48x1xf32>
    %21 = arith.addf %17, %20 : vector<48x1xf32>
    %22 = math.rsqrt %21 : vector<48x1xf32>
    %23 = vector.broadcast %22 : vector<48x1xf32> to vector<48x128xf32>
    %24 = arith.mulf %19, %23 : vector<48x128xf32>
    %c0_12 = arith.constant 0 : index
    %c0_13 = arith.constant 0 : index
    %25 = vector.load %arg5[%c0_12, %c0_13] : memref<1x128xf32, #tpu.memory_space<vmem>>, vector<1x128xf32>
    %26 = vector.broadcast %25 : vector<1x128xf32> to vector<48x128xf32>
    %27 = arith.mulf %24, %26 : vector<48x128xf32>
    %c0_14 = arith.constant 0 : index
    %c0_15 = arith.constant 0 : index
    %28 = vector.load %arg6[%c0_14, %c0_15] : memref<1x128xf32, #tpu.memory_space<vmem>>, vector<1x128xf32>
    %29 = vector.broadcast %28 : vector<1x128xf32> to vector<48x128xf32>
    %30 = arith.addf %27, %29 : vector<48x128xf32>
    %31 = arith.truncf %30 : vector<48x128xf32> to vector<48x128xbf16>
    %c0_16 = arith.constant 0 : index
    %c0_17 = arith.constant 0 : index
    %32 = vector.load %arg7[%c0_16, %c0_17] : memref<128x128xbf16, #tpu.memory_space<vmem>>, vector<128x128xbf16>
    %cst_18 = arith.constant dense<0.000000e+00> : vector<48x128xf32>
    %33 = tpu.matmul %31, %32, %cst_18 {dimension_numbers = #tpu.dot_dimension_numbers<[1], [0], [0], [1], [0, 0, 1, 1], [], []>} : vector<48x128xbf16>, vector<128x128xbf16>, vector<48x128xf32> -> vector<48x128xf32>
    %c0_19 = arith.constant 0 : index
    %c0_20 = arith.constant 0 : index
    %34 = vector.load %arg8[%c0_19, %c0_20] : memref<1x128xf32, #tpu.memory_space<vmem>>, vector<1x128xf32>
    %35 = vector.broadcast %34 : vector<1x128xf32> to vector<48x128xf32>
    %36 = arith.addf %33, %35 : vector<48x128xf32>
    %c0_21 = arith.constant 0 : index
    %c0_22 = arith.constant 0 : index
    %37 = vector.load %arg9[%c0_21, %c0_22] : memref<128x128xbf16, #tpu.memory_space<vmem>>, vector<128x128xbf16>
    %cst_23 = arith.constant dense<0.000000e+00> : vector<48x128xf32>
    %38 = tpu.matmul %31, %37, %cst_23 {dimension_numbers = #tpu.dot_dimension_numbers<[1], [0], [0], [1], [0, 0, 1, 1], [], []>} : vector<48x128xbf16>, vector<128x128xbf16>, vector<48x128xf32> -> vector<48x128xf32>
    %c0_24 = arith.constant 0 : index
    %c0_25 = arith.constant 0 : index
    %39 = vector.load %arg10[%c0_24, %c0_25] : memref<1x128xf32, #tpu.memory_space<vmem>>, vector<1x128xf32>
    %40 = vector.broadcast %39 : vector<1x128xf32> to vector<48x128xf32>
    %41 = arith.addf %38, %40 : vector<48x128xf32>
    %cst_26 = arith.constant 0.000000e+00 : f32
    %42 = vector.broadcast %cst_26 : f32 to vector<48x128xf32>
    %43 = arith.subf %42, %41 : vector<48x128xf32>
    %44 = math.exp %43 : vector<48x128xf32>
    %cst_27 = arith.constant 1.000000e+00 : f32
    %45 = vector.broadcast %cst_27 : f32 to vector<48x128xf32>
    %46 = arith.addf %45, %44 : vector<48x128xf32>
    %47 = tpu.reciprocal %46 {approx = true} : vector<48x128xf32> -> vector<48x128xf32>
    %48 = arith.mulf %36, %47 : vector<48x128xf32>
    %49 = tpu.iota {dimensions = array<i32: 0>} : vector<48x1xi32>
    %c16_i32 = arith.constant 16 : i32
    %50 = arith.muli %arg1, %c16_i32 : i32
    %c16_i32_28 = arith.constant 16 : i32
    %51 = arith.subi %50, %c16_i32_28 : i32
    %52 = vector.broadcast %51 : i32 to vector<48x1xi32>
    %53 = arith.addi %52, %49 : vector<48x1xi32>
    %c0_i32 = arith.constant 0 : i32
    %54 = vector.broadcast %c0_i32 : i32 to vector<48x1xi32>
    %55 = arith.cmpi sge, %53, %54 : vector<48x1xi32>
    %c40_i32 = arith.constant 40 : i32
    %56 = vector.broadcast %c40_i32 : i32 to vector<48x1xi32>
    %57 = arith.cmpi slt, %53, %56 : vector<48x1xi32>
    %58 = arith.andi %55, %57 : vector<48x1xi1>
    %cst_29 = arith.constant 0.000000e+00 : f32
    %59 = vector.shape_cast %58 : vector<48x1xi1> to vector<48x1xi1>
    %60 = vector.broadcast %59 : vector<48x1xi1> to vector<48x128xi1>
    %61 = vector.broadcast %cst_29 : f32 to vector<48x128xf32>
    %62 = arith.select %60, %48, %61 : vector<48x128xi1>, vector<48x128xf32>
    %c0_30 = arith.constant 0 : index
    %c0_31 = arith.constant 0 : index
    %63 = vector.load %arg16[%c0_30, %c0_31] : memref<48x128xf32, #tpu.memory_space<vmem>>, vector<48x128xf32>
    tpu.vector_store %arg16[%c0_30, %c0_31], %62 {strides = array<i32>} : memref<48x128xf32, #tpu.memory_space<vmem>>, vector<48x128xf32>,
    %cst_32 = arith.constant 0.000000e+00 : f32
    %64 = vector.broadcast %cst_32 : f32 to vector<16x128xf32>
    %c1 = arith.constant 1 : index
    %c0_33 = arith.constant 0 : index
    %65 = vector.load %arg16[%c1, %c0_33] : memref<48x128xf32, #tpu.memory_space<vmem>>, vector<16x128xf32>
    %c0_34 = arith.constant 0 : index
    %c0_35 = arith.constant 0 : index
    %66 = vector.load %arg11[%c0_34, %c0_35] : memref<31x128xf32, #tpu.memory_space<vmem>>, vector<1x128xf32>
    %67 = vector.shape_cast %66 : vector<1x128xf32> to vector<128xf32>
    %68 = vector.shape_cast %67 : vector<128xf32> to vector<1x128xf32>
    %69 = vector.broadcast %68 : vector<1x128xf32> to vector<16x128xf32>
    %70 = arith.mulf %65, %69 : vector<16x128xf32>
    %71 = arith.addf %64, %70 : vector<16x128xf32>
    %c2 = arith.constant 2 : index
    %c0_36 = arith.constant 0 : index
    %72 = vector.load %arg16[%c2, %c0_36] : memref<48x128xf32, #tpu.memory_space<vmem>>, vector<16x128xf32>
    %c1_37 = arith.constant 1 : index
    %c0_38 = arith.constant 0 : index
    %73 = vector.load %arg11[%c1_37, %c0_38] : memref<31x128xf32, #tpu.memory_space<vmem>>, vector<1x128xf32>
    %74 = vector.shape_cast %73 : vector<1x128xf32> to vector<128xf32>
    %75 = vector.shape_cast %74 : vector<128xf32> to vector<1x128xf32>
    %76 = vector.broadcast %75 : vector<1x128xf32> to vector<16x128xf32>
    %77 = arith.mulf %72, %76 : vector<16x128xf32>
    %78 = arith.addf %71, %77 : vector<16x128xf32>
    %c3 = arith.constant 3 : index
    %c0_39 = arith.constant 0 : index
    %79 = vector.load %arg16[%c3, %c0_39] : memref<48x128xf32, #tpu.memory_space<vmem>>, vector<16x128xf32>
    %c2_40 = arith.constant 2 : index
    %c0_41 = arith.constant 0 : index
    %80 = vector.load %arg11[%c2_40, %c0_41] : memref<31x128xf32, #tpu.memory_space<vmem>>, vector<1x128xf32>
    %81 = vector.shape_cast %80 : vector<1x128xf32> to vector<128xf32>
    %82 = vector.shape_cast %81 : vector<128xf32> to vector<1x128xf32>
    %83 = vector.broadcast %82 : vector<1x128xf32> to vector<16x128xf32>
    %84 = arith.mulf %79, %83 : vector<16x128xf32>
    %85 = arith.addf %78, %84 : vector<16x128xf32>
    %c4 = arith.constant 4 : index
    %c0_42 = arith.constant 0 : index
    %86 = vector.load %arg16[%c4, %c0_42] : memref<48x128xf32, #tpu.memory_space<vmem>>, vector<16x128xf32>
    %c3_43 = arith.constant 3 : index
    %c0_44 = arith.constant 0 : index
    %87 = vector.load %arg11[%c3_43, %c0_44] : memref<31x128xf32, #tpu.memory_space<vmem>>, vector<1x128xf32>
    %88 = vector.shape_cast %87 : vector<1x128xf32> to vector<128xf32>
    %89 = vector.shape_cast %88 : vector<128xf32> to vector<1x128xf32>
    %90 = vector.broadcast %89 : vector<1x128xf32> to vector<16x128xf32>
    %91 = arith.mulf %86, %90 : vector<16x128xf32>
    %92 = arith.addf %85, %91 : vector<16x128xf32>
    %c5 = arith.constant 5 : index
    %c0_45 = arith.constant 0 : index
    %93 = vector.load %arg16[%c5, %c0_45] : memref<48x128xf32, #tpu.memory_space<vmem>>, vector<16x128xf32>
    %c4_46 = arith.constant 4 : index
    %c0_47 = arith.constant 0 : index
    %94 = vector.load %arg11[%c4_46, %c0_47] : memref<31x128xf32, #tpu.memory_space<vmem>>, vector<1x128xf32>
    %95 = vector.shape_cast %94 : vector<1x128xf32> to vector<128xf32>
    %96 = vector.shape_cast %95 : vector<128xf32> to vector<1x128xf32>
    %97 = vector.broadcast %96 : vector<1x128xf32> to vector<16x128xf32>
    %98 = arith.mulf %93, %97 : vector<16x128xf32>
    %99 = arith.addf %92, %98 : vector<16x128xf32>
    %c6 = arith.constant 6 : index
    %c0_48 = arith.constant 0 : index
    %100 = vector.load %arg16[%c6, %c0_48] : memref<48x128xf32, #tpu.memory_space<vmem>>, vector<16x128xf32>
    %c5_49 = arith.constant 5 : index
    %c0_50 = arith.constant 0 : index
    %101 = vector.load %arg11[%c5_49, %c0_50] : memref<31x128xf32, #tpu.memory_space<vmem>>, vector<1x128xf32>
    %102 = vector.shape_cast %101 : vector<1x128xf32> to vector<128xf32>
    %103 = vector.shape_cast %102 : vector<128xf32> to vector<1x128xf32>
    %104 = vector.broadcast %103 : vector<1x128xf32> to vector<16x128xf32>
    %105 = arith.mulf %100, %104 : vector<16x128xf32>
    %106 = arith.addf %99, %105 : vector<16x128xf32>
    %c7 = arith.constant 7 : index
    %c0_51 = arith.constant 0 : index
    %107 = vector.load %arg16[%c7, %c0_51] : memref<48x128xf32, #tpu.memory_space<vmem>>, vector<16x128xf32>
    %c6_52 = arith.constant 6 : index
    %c0_53 = arith.constant 0 : index
    %108 = vector.load %arg11[%c6_52, %c0_53] : memref<31x128xf32, #tpu.memory_space<vmem>>, vector<1x128xf32>
    %109 = vector.shape_cast %108 : vector<1x128xf32> to vector<128xf32>
    %110 = vector.shape_cast %109 : vector<128xf32> to vector<1x128xf32>
    %111 = vector.broadcast %110 : vector<1x128xf32> to vector<16x128xf32>
    %112 = arith.mulf %107, %111 : vector<16x128xf32>
    %113 = arith.addf %106, %112 : vector<16x128xf32>
    %c8 = arith.constant 8 : index
    %c0_54 = arith.constant 0 : index
    %114 = vector.load %arg16[%c8, %c0_54] : memref<48x128xf32, #tpu.memory_space<vmem>>, vector<16x128xf32>
    %c7_55 = arith.constant 7 : index
    %c0_56 = arith.constant 0 : index
    %115 = vector.load %arg11[%c7_55, %c0_56] : memref<31x128xf32, #tpu.memory_space<vmem>>, vector<1x128xf32>
    %116 = vector.shape_cast %115 : vector<1x128xf32> to vector<128xf32>
    %117 = vector.shape_cast %116 : vector<128xf32> to vector<1x128xf32>
    %118 = vector.broadcast %117 : vector<1x128xf32> to vector<16x128xf32>
    %119 = arith.mulf %114, %118 : vector<16x128xf32>
    %120 = arith.addf %113, %119 : vector<16x128xf32>
    %c9 = arith.constant 9 : index
    %c0_57 = arith.constant 0 : index
    %121 = vector.load %arg16[%c9, %c0_57] : memref<48x128xf32, #tpu.memory_space<vmem>>, vector<16x128xf32>
    %c8_58 = arith.constant 8 : index
    %c0_59 = arith.constant 0 : index
    %122 = vector.load %arg11[%c8_58, %c0_59] : memref<31x128xf32, #tpu.memory_space<vmem>>, vector<1x128xf32>
    %123 = vector.shape_cast %122 : vector<1x128xf32> to vector<128xf32>
    %124 = vector.shape_cast %123 : vector<128xf32> to vector<1x128xf32>
    %125 = vector.broadcast %124 : vector<1x128xf32> to vector<16x128xf32>
    %126 = arith.mulf %121, %125 : vector<16x128xf32>
    %127 = arith.addf %120, %126 : vector<16x128xf32>
    %c10 = arith.constant 10 : index
    %c0_60 = arith.constant 0 : index
    %128 = vector.load %arg16[%c10, %c0_60] : memref<48x128xf32, #tpu.memory_space<vmem>>, vector<16x128xf32>
    %c9_61 = arith.constant 9 : index
    %c0_62 = arith.constant 0 : index
    %129 = vector.load %arg11[%c9_61, %c0_62] : memref<31x128xf32, #tpu.memory_space<vmem>>, vector<1x128xf32>
    %130 = vector.shape_cast %129 : vector<1x128xf32> to vector<128xf32>
    %131 = vector.shape_cast %130 : vector<128xf32> to vector<1x128xf32>
    %132 = vector.broadcast %131 : vector<1x128xf32> to vector<16x128xf32>
    %133 = arith.mulf %128, %132 : vector<16x128xf32>
    %134 = arith.addf %127, %133 : vector<16x128xf32>
    %c11 = arith.constant 11 : index
    %c0_63 = arith.constant 0 : index
    %135 = vector.load %arg16[%c11, %c0_63] : memref<48x128xf32, #tpu.memory_space<vmem>>, vector<16x128xf32>
    %c10_64 = arith.constant 10 : index
    %c0_65 = arith.constant 0 : index
    %136 = vector.load %arg11[%c10_64, %c0_65] : memref<31x128xf32, #tpu.memory_space<vmem>>, vector<1x128xf32>
    %137 = vector.shape_cast %136 : vector<1x128xf32> to vector<128xf32>
    %138 = vector.shape_cast %137 : vector<128xf32> to vector<1x128xf32>
    %139 = vector.broadcast %138 : vector<1x128xf32> to vector<16x128xf32>
    %140 = arith.mulf %135, %139 : vector<16x128xf32>
    %141 = arith.addf %134, %140 : vector<16x128xf32>
    %c12 = arith.constant 12 : index
    %c0_66 = arith.constant 0 : index
    %142 = vector.load %arg16[%c12, %c0_66] : memref<48x128xf32, #tpu.memory_space<vmem>>, vector<16x128xf32>
    %c11_67 = arith.constant 11 : index
    %c0_68 = arith.constant 0 : index
    %143 = vector.load %arg11[%c11_67, %c0_68] : memref<31x128xf32, #tpu.memory_space<vmem>>, vector<1x128xf32>
    %144 = vector.shape_cast %143 : vector<1x128xf32> to vector<128xf32>
    %145 = vector.shape_cast %144 : vector<128xf32> to vector<1x128xf32>
    %146 = vector.broadcast %145 : vector<1x128xf32> to vector<16x128xf32>
    %147 = arith.mulf %142, %146 : vector<16x128xf32>
    %148 = arith.addf %141, %147 : vector<16x128xf32>
    %c13 = arith.constant 13 : index
    %c0_69 = arith.constant 0 : index
    %149 = vector.load %arg16[%c13, %c0_69] : memref<48x128xf32, #tpu.memory_space<vmem>>, vector<16x128xf32>
    %c12_70 = arith.constant 12 : index
    %c0_71 = arith.constant 0 : index
    %150 = vector.load %arg11[%c12_70, %c0_71] : memref<31x128xf32, #tpu.memory_space<vmem>>, vector<1x128xf32>
    %151 = vector.shape_cast %150 : vector<1x128xf32> to vector<128xf32>
    %152 = vector.shape_cast %151 : vector<128xf32> to vector<1x128xf32>
    %153 = vector.broadcast %152 : vector<1x128xf32> to vector<16x128xf32>
    %154 = arith.mulf %149, %153 : vector<16x128xf32>
    %155 = arith.addf %148, %154 : vector<16x128xf32>
    %c14 = arith.constant 14 : index
    %c0_72 = arith.constant 0 : index
    %156 = vector.load %arg16[%c14, %c0_72] : memref<48x128xf32, #tpu.memory_space<vmem>>, vector<16x128xf32>
    %c13_73 = arith.constant 13 : index
    %c0_74 = arith.constant 0 : index
    %157 = vector.load %arg11[%c13_73, %c0_74] : memref<31x128xf32, #tpu.memory_space<vmem>>, vector<1x128xf32>
    %158 = vector.shape_cast %157 : vector<1x128xf32> to vector<128xf32>
    %159 = vector.shape_cast %158 : vector<128xf32> to vector<1x128xf32>
    %160 = vector.broadcast %159 : vector<1x128xf32> to vector<16x128xf32>
    %161 = arith.mulf %156, %160 : vector<16x128xf32>
    %162 = arith.addf %155, %161 : vector<16x128xf32>
    %c15 = arith.constant 15 : index
    %c0_75 = arith.constant 0 : index
    %163 = vector.load %arg16[%c15, %c0_75] : memref<48x128xf32, #tpu.memory_space<vmem>>, vector<16x128xf32>
    %c14_76 = arith.constant 14 : index
    %c0_77 = arith.constant 0 : index
    %164 = vector.load %arg11[%c14_76, %c0_77] : memref<31x128xf32, #tpu.memory_space<vmem>>, vector<1x128xf32>
    %165 = vector.shape_cast %164 : vector<1x128xf32> to vector<128xf32>
    %166 = vector.shape_cast %165 : vector<128xf32> to vector<1x128xf32>
    %167 = vector.broadcast %166 : vector<1x128xf32> to vector<16x128xf32>
    %168 = arith.mulf %163, %167 : vector<16x128xf32>
    %169 = arith.addf %162, %168 : vector<16x128xf32>
    %c16 = arith.constant 16 : index
    %c0_78 = arith.constant 0 : index
    %170 = vector.load %arg16[%c16, %c0_78] : memref<48x128xf32, #tpu.memory_space<vmem>>, vector<16x128xf32>
    %c15_79 = arith.constant 15 : index
    %c0_80 = arith.constant 0 : index
    %171 = vector.load %arg11[%c15_79, %c0_80] : memref<31x128xf32, #tpu.memory_space<vmem>>, vector<1x128xf32>
    %172 = vector.shape_cast %171 : vector<1x128xf32> to vector<128xf32>
    %173 = vector.shape_cast %172 : vector<128xf32> to vector<1x128xf32>
    %174 = vector.broadcast %173 : vector<1x128xf32> to vector<16x128xf32>
    %175 = arith.mulf %170, %174 : vector<16x128xf32>
    %176 = arith.addf %169, %175 : vector<16x128xf32>
    %c17 = arith.constant 17 : index
    %c0_81 = arith.constant 0 : index
    %177 = vector.load %arg16[%c17, %c0_81] : memref<48x128xf32, #tpu.memory_space<vmem>>, vector<16x128xf32>
    %c16_82 = arith.constant 16 : index
    %c0_83 = arith.constant 0 : index
    %178 = vector.load %arg11[%c16_82, %c0_83] : memref<31x128xf32, #tpu.memory_space<vmem>>, vector<1x128xf32>
    %179 = vector.shape_cast %178 : vector<1x128xf32> to vector<128xf32>
    %180 = vector.shape_cast %179 : vector<128xf32> to vector<1x128xf32>
    %181 = vector.broadcast %180 : vector<1x128xf32> to vector<16x128xf32>
    %182 = arith.mulf %177, %181 : vector<16x128xf32>
    %183 = arith.addf %176, %182 : vector<16x128xf32>
    %c18 = arith.constant 18 : index
    %c0_84 = arith.constant 0 : index
    %184 = vector.load %arg16[%c18, %c0_84] : memref<48x128xf32, #tpu.memory_space<vmem>>, vector<16x128xf32>
    %c17_85 = arith.constant 17 : index
    %c0_86 = arith.constant 0 : index
    %185 = vector.load %arg11[%c17_85, %c0_86] : memref<31x128xf32, #tpu.memory_space<vmem>>, vector<1x128xf32>
    %186 = vector.shape_cast %185 : vector<1x128xf32> to vector<128xf32>
    %187 = vector.shape_cast %186 : vector<128xf32> to vector<1x128xf32>
    %188 = vector.broadcast %187 : vector<1x128xf32> to vector<16x128xf32>
    %189 = arith.mulf %184, %188 : vector<16x128xf32>
    %190 = arith.addf %183, %189 : vector<16x128xf32>
    %c19 = arith.constant 19 : index
    %c0_87 = arith.constant 0 : index
    %191 = vector.load %arg16[%c19, %c0_87] : memref<48x128xf32, #tpu.memory_space<vmem>>, vector<16x128xf32>
    %c18_88 = arith.constant 18 : index
    %c0_89 = arith.constant 0 : index
    %192 = vector.load %arg11[%c18_88, %c0_89] : memref<31x128xf32, #tpu.memory_space<vmem>>, vector<1x128xf32>
    %193 = vector.shape_cast %192 : vector<1x128xf32> to vector<128xf32>
    %194 = vector.shape_cast %193 : vector<128xf32> to vector<1x128xf32>
    %195 = vector.broadcast %194 : vector<1x128xf32> to vector<16x128xf32>
    %196 = arith.mulf %191, %195 : vector<16x128xf32>
    %197 = arith.addf %190, %196 : vector<16x128xf32>
    %c20 = arith.constant 20 : index
    %c0_90 = arith.constant 0 : index
    %198 = vector.load %arg16[%c20, %c0_90] : memref<48x128xf32, #tpu.memory_space<vmem>>, vector<16x128xf32>
    %c19_91 = arith.constant 19 : index
    %c0_92 = arith.constant 0 : index
    %199 = vector.load %arg11[%c19_91, %c0_92] : memref<31x128xf32, #tpu.memory_space<vmem>>, vector<1x128xf32>
    %200 = vector.shape_cast %199 : vector<1x128xf32> to vector<128xf32>
    %201 = vector.shape_cast %200 : vector<128xf32> to vector<1x128xf32>
    %202 = vector.broadcast %201 : vector<1x128xf32> to vector<16x128xf32>
    %203 = arith.mulf %198, %202 : vector<16x128xf32>
    %204 = arith.addf %197, %203 : vector<16x128xf32>
    %c21 = arith.constant 21 : index
    %c0_93 = arith.constant 0 : index
    %205 = vector.load %arg16[%c21, %c0_93] : memref<48x128xf32, #tpu.memory_space<vmem>>, vector<16x128xf32>
    %c20_94 = arith.constant 20 : index
    %c0_95 = arith.constant 0 : index
    %206 = vector.load %arg11[%c20_94, %c0_95] : memref<31x128xf32, #tpu.memory_space<vmem>>, vector<1x128xf32>
    %207 = vector.shape_cast %206 : vector<1x128xf32> to vector<128xf32>
    %208 = vector.shape_cast %207 : vector<128xf32> to vector<1x128xf32>
    %209 = vector.broadcast %208 : vector<1x128xf32> to vector<16x128xf32>
    %210 = arith.mulf %205, %209 : vector<16x128xf32>
    %211 = arith.addf %204, %210 : vector<16x128xf32>
    %c22 = arith.constant 22 : index
    %c0_96 = arith.constant 0 : index
    %212 = vector.load %arg16[%c22, %c0_96] : memref<48x128xf32, #tpu.memory_space<vmem>>, vector<16x128xf32>
    %c21_97 = arith.constant 21 : index
    %c0_98 = arith.constant 0 : index
    %213 = vector.load %arg11[%c21_97, %c0_98] : memref<31x128xf32, #tpu.memory_space<vmem>>, vector<1x128xf32>
    %214 = vector.shape_cast %213 : vector<1x128xf32> to vector<128xf32>
    %215 = vector.shape_cast %214 : vector<128xf32> to vector<1x128xf32>
    %216 = vector.broadcast %215 : vector<1x128xf32> to vector<16x128xf32>
    %217 = arith.mulf %212, %216 : vector<16x128xf32>
    %218 = arith.addf %211, %217 : vector<16x128xf32>
    %c23 = arith.constant 23 : index
    %c0_99 = arith.constant 0 : index
    %219 = vector.load %arg16[%c23, %c0_99] : memref<48x128xf32, #tpu.memory_space<vmem>>, vector<16x128xf32>
    %c22_100 = arith.constant 22 : index
    %c0_101 = arith.constant 0 : index
    %220 = vector.load %arg11[%c22_100, %c0_101] : memref<31x128xf32, #tpu.memory_space<vmem>>, vector<1x128xf32>
    %221 = vector.shape_cast %220 : vector<1x128xf32> to vector<128xf32>
    %222 = vector.shape_cast %221 : vector<128xf32> to vector<1x128xf32>
    %223 = vector.broadcast %222 : vector<1x128xf32> to vector<16x128xf32>
    %224 = arith.mulf %219, %223 : vector<16x128xf32>
    %225 = arith.addf %218, %224 : vector<16x128xf32>
    %c24 = arith.constant 24 : index
    %c0_102 = arith.constant 0 : index
    %226 = vector.load %arg16[%c24, %c0_102] : memref<48x128xf32, #tpu.memory_space<vmem>>, vector<16x128xf32>
    %c23_103 = arith.constant 23 : index
    %c0_104 = arith.constant 0 : index
    %227 = vector.load %arg11[%c23_103, %c0_104] : memref<31x128xf32, #tpu.memory_space<vmem>>, vector<1x128xf32>
    %228 = vector.shape_cast %227 : vector<1x128xf32> to vector<128xf32>
    %229 = vector.shape_cast %228 : vector<128xf32> to vector<1x128xf32>
    %230 = vector.broadcast %229 : vector<1x128xf32> to vector<16x128xf32>
    %231 = arith.mulf %226, %230 : vector<16x128xf32>
    %232 = arith.addf %225, %231 : vector<16x128xf32>
    %c25 = arith.constant 25 : index
    %c0_105 = arith.constant 0 : index
    %233 = vector.load %arg16[%c25, %c0_105] : memref<48x128xf32, #tpu.memory_space<vmem>>, vector<16x128xf32>
    %c24_106 = arith.constant 24 : index
    %c0_107 = arith.constant 0 : index
    %234 = vector.load %arg11[%c24_106, %c0_107] : memref<31x128xf32, #tpu.memory_space<vmem>>, vector<1x128xf32>
    %235 = vector.shape_cast %234 : vector<1x128xf32> to vector<128xf32>
    %236 = vector.shape_cast %235 : vector<128xf32> to vector<1x128xf32>
    %237 = vector.broadcast %236 : vector<1x128xf32> to vector<16x128xf32>
    %238 = arith.mulf %233, %237 : vector<16x128xf32>
    %239 = arith.addf %232, %238 : vector<16x128xf32>
    %c26 = arith.constant 26 : index
    %c0_108 = arith.constant 0 : index
    %240 = vector.load %arg16[%c26, %c0_108] : memref<48x128xf32, #tpu.memory_space<vmem>>, vector<16x128xf32>
    %c25_109 = arith.constant 25 : index
    %c0_110 = arith.constant 0 : index
    %241 = vector.load %arg11[%c25_109, %c0_110] : memref<31x128xf32, #tpu.memory_space<vmem>>, vector<1x128xf32>
    %242 = vector.shape_cast %241 : vector<1x128xf32> to vector<128xf32>
    %243 = vector.shape_cast %242 : vector<128xf32> to vector<1x128xf32>
    %244 = vector.broadcast %243 : vector<1x128xf32> to vector<16x128xf32>
    %245 = arith.mulf %240, %244 : vector<16x128xf32>
    %246 = arith.addf %239, %245 : vector<16x128xf32>
    %c27 = arith.constant 27 : index
    %c0_111 = arith.constant 0 : index
    %247 = vector.load %arg16[%c27, %c0_111] : memref<48x128xf32, #tpu.memory_space<vmem>>, vector<16x128xf32>
    %c26_112 = arith.constant 26 : index
    %c0_113 = arith.constant 0 : index
    %248 = vector.load %arg11[%c26_112, %c0_113] : memref<31x128xf32, #tpu.memory_space<vmem>>, vector<1x128xf32>
    %249 = vector.shape_cast %248 : vector<1x128xf32> to vector<128xf32>
    %250 = vector.shape_cast %249 : vector<128xf32> to vector<1x128xf32>
    %251 = vector.broadcast %250 : vector<1x128xf32> to vector<16x128xf32>
    %252 = arith.mulf %247, %251 : vector<16x128xf32>
    %253 = arith.addf %246, %252 : vector<16x128xf32>
    %c28 = arith.constant 28 : index
    %c0_114 = arith.constant 0 : index
    %254 = vector.load %arg16[%c28, %c0_114] : memref<48x128xf32, #tpu.memory_space<vmem>>, vector<16x128xf32>
    %c27_115 = arith.constant 27 : index
    %c0_116 = arith.constant 0 : index
    %255 = vector.load %arg11[%c27_115, %c0_116] : memref<31x128xf32, #tpu.memory_space<vmem>>, vector<1x128xf32>
    %256 = vector.shape_cast %255 : vector<1x128xf32> to vector<128xf32>
    %257 = vector.shape_cast %256 : vector<128xf32> to vector<1x128xf32>
    %258 = vector.broadcast %257 : vector<1x128xf32> to vector<16x128xf32>
    %259 = arith.mulf %254, %258 : vector<16x128xf32>
    %260 = arith.addf %253, %259 : vector<16x128xf32>
    %c29 = arith.constant 29 : index
    %c0_117 = arith.constant 0 : index
    %261 = vector.load %arg16[%c29, %c0_117] : memref<48x128xf32, #tpu.memory_space<vmem>>, vector<16x128xf32>
    %c28_118 = arith.constant 28 : index
    %c0_119 = arith.constant 0 : index
    %262 = vector.load %arg11[%c28_118, %c0_119] : memref<31x128xf32, #tpu.memory_space<vmem>>, vector<1x128xf32>
    %263 = vector.shape_cast %262 : vector<1x128xf32> to vector<128xf32>
    %264 = vector.shape_cast %263 : vector<128xf32> to vector<1x128xf32>
    %265 = vector.broadcast %264 : vector<1x128xf32> to vector<16x128xf32>
    %266 = arith.mulf %261, %265 : vector<16x128xf32>
    %267 = arith.addf %260, %266 : vector<16x128xf32>
    %c30 = arith.constant 30 : index
    %c0_120 = arith.constant 0 : index
    %268 = vector.load %arg16[%c30, %c0_120] : memref<48x128xf32, #tpu.memory_space<vmem>>, vector<16x128xf32>
    %c29_121 = arith.constant 29 : index
    %c0_122 = arith.constant 0 : index
    %269 = vector.load %arg11[%c29_121, %c0_122] : memref<31x128xf32, #tpu.memory_space<vmem>>, vector<1x128xf32>
    %270 = vector.shape_cast %269 : vector<1x128xf32> to vector<128xf32>
    %271 = vector.shape_cast %270 : vector<128xf32> to vector<1x128xf32>
    %272 = vector.broadcast %271 : vector<1x128xf32> to vector<16x128xf32>
    %273 = arith.mulf %268, %272 : vector<16x128xf32>
    %274 = arith.addf %267, %273 : vector<16x128xf32>
    %c31 = arith.constant 31 : index
    %c0_123 = arith.constant 0 : index
    %275 = vector.load %arg16[%c31, %c0_123] : memref<48x128xf32, #tpu.memory_space<vmem>>, vector<16x128xf32>
    %c30_124 = arith.constant 30 : index
    %c0_125 = arith.constant 0 : index
    %276 = vector.load %arg11[%c30_124, %c0_125] : memref<31x128xf32, #tpu.memory_space<vmem>>, vector<1x128xf32>
    %277 = vector.shape_cast %276 : vector<1x128xf32> to vector<128xf32>
    %278 = vector.shape_cast %277 : vector<128xf32> to vector<1x128xf32>
    %279 = vector.broadcast %278 : vector<1x128xf32> to vector<16x128xf32>
    %280 = arith.mulf %275, %279 : vector<16x128xf32>
    %281 = arith.addf %274, %280 : vector<16x128xf32>
    %c0_126 = arith.constant 0 : index
    %c0_127 = arith.constant 0 : index
    %282 = vector.load %arg12[%c0_126, %c0_127] : memref<1x128xf32, #tpu.memory_space<vmem>>, vector<1x128xf32>
    %283 = vector.broadcast %282 : vector<1x128xf32> to vector<16x128xf32>
    %284 = arith.addf %281, %283 : vector<16x128xf32>
    %cst_128 = arith.constant 0.000000e+00 : f32
    %285 = vector.broadcast %cst_128 : f32 to vector<16x128xf32>
    %286 = arith.subf %285, %284 : vector<16x128xf32>
    %287 = math.exp %286 : vector<16x128xf32>
    %cst_129 = arith.constant 1.000000e+00 : f32
    %288 = vector.broadcast %cst_129 : f32 to vector<16x128xf32>
    %289 = arith.addf %288, %287 : vector<16x128xf32>
    %290 = tpu.reciprocal %289 {approx = true} : vector<16x128xf32> -> vector<16x128xf32>
    %291 = arith.mulf %284, %290 : vector<16x128xf32>
    %292 = arith.truncf %291 : vector<16x128xf32> to vector<16x128xbf16>
    %c0_130 = arith.constant 0 : index
    %c0_131 = arith.constant 0 : index
    %293 = vector.load %arg13[%c0_130, %c0_131] : memref<128x128xbf16, #tpu.memory_space<vmem>>, vector<128x128xbf16>
    %cst_132 = arith.constant dense<0.000000e+00> : vector<16x128xf32>
    %294 = tpu.matmul %292, %293, %cst_132 {dimension_numbers = #tpu.dot_dimension_numbers<[1], [0], [0], [1], [0, 0, 1, 1], [], []>} : vector<16x128xbf16>, vector<128x128xbf16>, vector<16x128xf32> -> vector<16x128xf32>
    %c0_133 = arith.constant 0 : index
    %c0_134 = arith.constant 0 : index
    %295 = vector.load %arg14[%c0_133, %c0_134] : memref<1x128xf32, #tpu.memory_space<vmem>>, vector<1x128xf32>
    %296 = vector.broadcast %295 : vector<1x128xf32> to vector<16x128xf32>
    %297 = arith.addf %294, %296 : vector<16x128xf32>
    %c0_135 = arith.constant 0 : index
    %c0_136 = arith.constant 0 : index
    %c0_137 = arith.constant 0 : index
    %298 = vector.load %arg15[%c0_135, %c0_136, %c0_137] : memref<1x16x128xf32, #tpu.memory_space<vmem>>, vector<1x16x128xf32>
    %299 = vector.shape_cast %298 : vector<1x16x128xf32> to vector<16x128xf32>
    %300 = vector.shape_cast %297 : vector<16x128xf32> to vector<1x16x128xf32>
    tpu.vector_store %arg15[%c0_135, %c0_136, %c0_137], %300 {strides = array<i32>} : memref<1x16x128xf32, #tpu.memory_space<vmem>>, vector<1x16x128xf32>,
    return
  }
  func.func @transform_0(%arg0: i32, %arg1: i32) -> (i32, i32, i32) {
    %c0_i32 = arith.constant 0 : i32
    %c0_i32_0 = arith.constant 0 : i32
    return %arg0, %arg1, %c0_i32 : i32, i32, i32
  }
  func.func @transform_1(%arg0: i32, %arg1: i32) -> (i32, i32, i32) {
    %c1_i32 = arith.constant 1 : i32
    %0 = arith.muli %arg1, %c1_i32 : i32
    %c1_i32_0 = arith.constant 1 : i32
    %1 = arith.subi %0, %c1_i32_0 : i32
    %c0_i32 = arith.constant 0 : i32
    %2 = arith.maxsi %1, %c0_i32 : i32
    %c0_i32_1 = arith.constant 0 : i32
    %c0_i32_2 = arith.constant 0 : i32
    return %arg0, %2, %c0_i32_1 : i32, i32, i32
  }
  func.func @transform_2(%arg0: i32, %arg1: i32) -> (i32, i32, i32) {
    %c1_i32 = arith.constant 1 : i32
    %0 = arith.addi %arg1, %c1_i32 : i32
    %c1_i32_0 = arith.constant 1 : i32
    %1 = arith.muli %0, %c1_i32_0 : i32
    %c2_i32 = arith.constant 2 : i32
    %2 = arith.minsi %1, %c2_i32 : i32
    %c0_i32 = arith.constant 0 : i32
    %c0_i32_1 = arith.constant 0 : i32
    return %arg0, %2, %c0_i32 : i32, i32, i32
  }
  func.func @transform_3(%arg0: i32, %arg1: i32) -> (i32, i32) {
    %c0_i32 = arith.constant 0 : i32
    %c0_i32_0 = arith.constant 0 : i32
    %c0_i32_1 = arith.constant 0 : i32
    return %c0_i32, %c0_i32_0 : i32, i32
  }
  func.func @transform_4(%arg0: i32, %arg1: i32) -> (i32, i32) {
    %c0_i32 = arith.constant 0 : i32
    %c0_i32_0 = arith.constant 0 : i32
    %c0_i32_1 = arith.constant 0 : i32
    return %c0_i32, %c0_i32_0 : i32, i32
  }
  func.func @transform_5(%arg0: i32, %arg1: i32) -> (i32, i32) {
    %c0_i32 = arith.constant 0 : i32
    %c0_i32_0 = arith.constant 0 : i32
    %c0_i32_1 = arith.constant 0 : i32
    return %c0_i32, %c0_i32_0 : i32, i32
  }
  func.func @transform_6(%arg0: i32, %arg1: i32) -> (i32, i32) {
    %c0_i32 = arith.constant 0 : i32
    %c0_i32_0 = arith.constant 0 : i32
    %c0_i32_1 = arith.constant 0 : i32
    return %c0_i32, %c0_i32_0 : i32, i32
  }
  func.func @transform_7(%arg0: i32, %arg1: i32) -> (i32, i32) {
    %c0_i32 = arith.constant 0 : i32
    %c0_i32_0 = arith.constant 0 : i32
    %c0_i32_1 = arith.constant 0 : i32
    return %c0_i32, %c0_i32_0 : i32, i32
  }
  func.func @transform_8(%arg0: i32, %arg1: i32) -> (i32, i32) {
    %c0_i32 = arith.constant 0 : i32
    %c0_i32_0 = arith.constant 0 : i32
    %c0_i32_1 = arith.constant 0 : i32
    return %c0_i32, %c0_i32_0 : i32, i32
  }
  func.func @transform_9(%arg0: i32, %arg1: i32) -> (i32, i32) {
    %c0_i32 = arith.constant 0 : i32
    %c0_i32_0 = arith.constant 0 : i32
    %c0_i32_1 = arith.constant 0 : i32
    return %c0_i32, %c0_i32_0 : i32, i32
  }
  func.func @transform_10(%arg0: i32, %arg1: i32) -> (i32, i32) {
    %c0_i32 = arith.constant 0 : i32
    %c0_i32_0 = arith.constant 0 : i32
    %c0_i32_1 = arith.constant 0 : i32
    return %c0_i32, %c0_i32_0 : i32, i32
  }
  func.func @transform_11(%arg0: i32, %arg1: i32) -> (i32, i32) {
    %c0_i32 = arith.constant 0 : i32
    %c0_i32_0 = arith.constant 0 : i32
    %c0_i32_1 = arith.constant 0 : i32
    return %c0_i32, %c0_i32_0 : i32, i32
  }
  func.func @transform_12(%arg0: i32, %arg1: i32) -> (i32, i32) {
    %c0_i32 = arith.constant 0 : i32
    %c0_i32_0 = arith.constant 0 : i32
    %c0_i32_1 = arith.constant 0 : i32
    return %c0_i32, %c0_i32_0 : i32, i32
  }
  func.func @transform_13(%arg0: i32, %arg1: i32) -> (i32, i32, i32) {
    %c0_i32 = arith.constant 0 : i32
    %c0_i32_0 = arith.constant 0 : i32
    return %arg0, %arg1, %c0_i32 : i32, i32, i32
  }
}

</mosaic_0001>

<bundles_post_ra>
// kernel: tpu_custom_call.1
= control target key start
LH: loop header
LB: loop body
LE: loop exit
PB: predicated region body
PF: predicated region fallthrough
CT: control target
= control target key end

     0   :  { %s3556_s0 = inlined_call_operand.hbm [shape: f32[2,48,128], index: 0, kind: input, shape index: {}]   ;;  %s3557_s1 = inlined_call_operand.hbm [shape: f32[2,48,128], index: 1, kind: input, shape index: {}]   ;;  %s3558_s2 = inlined_call_operand.hbm [shape: f32[2,48,128], index: 2, kind: input, shape index: {}]   ;;  %s3559_s3 = inlined_call_operand.vmem [shape: f32[1,128], index: 3, kind: input, shape index: {}]   ;;  %s3560_s4 = inlined_call_operand.vmem [shape: f32[1,128], index: 4, kind: input, shape index: {}]   ;;  %s3561_s5 = inlined_call_operand.hbm [shape: bf16[128,128], index: 5, kind: input, shape index: {}]   ;;  %s3562_s6 = inlined_call_operand.hbm [shape: f32[1,128], index: 6, kind: input, shape index: {}]   ;;  %s3563_s7 = inlined_call_operand.hbm [shape: bf16[128,128], index: 7, kind: input, shape index: {}]   ;;  %s3564_s8 = inlined_call_operand.hbm [shape: f32[1,128], index: 8, kind: input, shape index: {}]   ;;  %s3565_s9 = inlined_call_operand.vmem [shape: f32[31,128], index: 9, kind: input, shape index: {}]   ;;  %s3566_s10 = inlined_call_operand.vmem [shape: f32[1,128], index: 10, kind: input, shape index: {}]   ;;  %s3567_s11 = inlined_call_operand.hbm [shape: bf16[128,128], index: 11, kind: input, shape index: {}]   ;;  %s3568_s12 = inlined_call_operand.vmem [shape: f32[1,128], index: 12, kind: input, shape index: {}]   ;;  %s3569_s13 = inlined_call_operand.hbm [shape: f32[2,48,128], index: 13, kind: output, shape index: {}]  }
   0x1   :  { %3608 = sst [smem:[#allocation44_spill]] %s3556_s0 }
   0x2   :  { %3609 = sst [smem:[#allocation45_spill]] %s3557_s1 }
   0x3   :  { %3610 = sst [smem:[#allocation46_spill]] %s3558_s2 }
   0x4   :  { %3611 = sst [smem:[#allocation47_spill]] %s3559_s3 }
   0x5   :  { %3612 = sst [smem:[#allocation48_spill]] %s3560_s4 }
   0x6   :  { %3613 = sst [smem:[#allocation49_spill]] %s3561_s5 }
   0x7   :  { %3614 = sst [smem:[#allocation50_spill]] %s3562_s6 }
   0x8   :  { %3615 = sst [smem:[#allocation51_spill]] %s3563_s7 }
   0x9   :  { %3616 = sst [smem:[#allocation52_spill]] %s3564_s8 }
   0xa   :  { %3617 = sst [smem:[#allocation53_spill]] %s3565_s9 }
   0xb   :  { %3618 = sst [smem:[#allocation54_spill]] %s3566_s10 }
   0xc   :  { %3619 = sst [smem:[#allocation55_spill]] %s3567_s11 }
   0xd   :  { %3620 = sst [smem:[#allocation56_spill]] %s3568_s12 }
   0xe   :  { %3621 = sst [smem:[#allocation57_spill]] %s3569_s13 }
   0xf   :  { %18 = vsyncpa [#allocation4], 0 }
  0x10   :  { %20 = vsyncpa [#allocation4 + $0x1], 0 }
  0x11   :  { %21 = vsyncpa [#allocation7], 0 }
  0x12   :  { %23 = vsyncpa [#allocation7 + $0x1], 0 }
  0x13   :  { %24 = vsyncpa [#allocation10], 0 }
  0x14   :  { %25 = vsyncpa [#allocation13], 0 }
  0x15   :  { %26 = vsyncpa [#allocation16], 0 }
  0x16   :  { %27 = vsyncpa [#allocation5], 0 }
  0x17   :  { %29 = vsyncpa [#allocation5 + $0x1], 0  ;;  %s2738_s25 = smov 0   ;;  %s2740_s26 = smov 0  }
  0x18   :  { %s2742_s27 = smov 0   ;;  %s2744_s28 = smov 0  }
  0x19   :  { %s2746_s29 = smov 0   ;;  %s2748_s30 = smov 0  }
  0x1a   :  { %s2750_s14 = smov 0   ;;  %s2752_s15 = smov 0  }
  0x1b   :  { %s2754_s16 = smov 0   ;;  %s2756_s17 = smov 0  }
  0x1c   :  { %s2758_s18 = smov 0   ;;  %s2760_s19 = smov 0  }
  0x1d   :  { %s2762_s20 = smov 0   ;;  %s2764_s21 = smov 0  }
  0x1e LB: > { %3622 = sst [smem:[#allocation25_spill]] %s2597_s25  ;;  %s2809_s22 = sadd.s32 4294967295, %s2649_s21   ;;  %s2649_s21 = sphi %s2764_s21, %s35_s21   ;;  %s2645_s20 = sphi %s2762_s20, %s3724_s20   ;;  %s2641_s19 = sphi %s2760_s19, %s3723_s19   ;;  %s2637_s18 = sphi %s2758_s18, %s3722_s18   ;;  %s2633_s17 = sphi %s2756_s17, %s3721_s17   ;;  %s2629_s16 = sphi %s2754_s16, %s3720_s16   ;;  %s2625_s15 = sphi %s2752_s15, %s3729_s15   ;;  %s2621_s14 = sphi %s2750_s14, %s3728_s14   ;;  %s2617_s30 = sphi %s2748_s30, %s3727_s30   ;;  %s2613_s29 = sphi %s2746_s29, %s3726_s29   ;;  %s2609_s28 = sphi %s2744_s28, %s3717_s28   ;;  %s2605_s27 = sphi %s2742_s27, %s3725_s27   ;;  %s2601_s26 = sphi %s2740_s26, %s3716_s26   ;;  %s2597_s25 = sphi %s2738_s25, %s3715_s25  }
  0x1f   : > { %3623 = sst [smem:[#allocation26_spill]] %s2601_s26  ;;  %p1784_p0 = scmp.ge.s32.totalorder %s2649_s21, 1 }
  0x20   : > { %3624 = sst [smem:[#allocation27_spill]] %s2605_s27  ;;  %p3575_p1 = scmp.eq.s32.totalorder %s2809_s22, 0 }
  0x21   : > { %3625 = sst [smem:[#allocation28_spill]] %s2613_s29  ;;  %p386_p2 = scmp.lt.s32.totalorder %s2649_s21, 7 }
  0x22   : > { %3626 = sst [smem:[#allocation29_spill]] %s2621_s14  ;;  %s2651_s24 = smov [#allocation9]  }
  0x23   : > { %3627 = sst [smem:[#allocation30_spill]] %s2629_s16  ;;  %p2814_p3 = pnand %p1784_p0, %p386_p2 }
  0x24   : > { %3628 = sst [smem:[#allocation31_spill]] %s2633_s17  ;;  %s404_s13 = sshll.u32 %s2651_s24, 4  ;;  %s405_s13 = int_to_ptr.vmem [resolvable:$true] %s404_s13 }
  0x25   : > { %3629 = sst [smem:[#allocation32_spill]] %s2637_s18  ;;  %p2018_p4 = pneg %p2814_p3 }
  0x26   : > { %3630 = sst [smem:[#allocation33_spill]] %s2641_s19  ;;  %s2652_s18 = smov [#allocation12]  }
  0x27   : > { %3631 = sst [smem:[#allocation34_spill]] %s2645_s20  ;;  %p2822_p5 = pnand %p2018_p4, %p3575_p1 }
  0x28   : > { %3632 = sst [smem:[#allocation35_spill]] %s2809_s22  ;;  %s428_s10 = sshll.u32 %s2652_s18, 4  ;;  %s2826_s10 = int_to_ptr.vmem [resolvable:$true] %s428_s10 }
  0x29   : > { %s3633_s23 = scalar_select %p2814_p3, 1, 0 }
  0x2a   : > { %s3635_s12 = scalar_select %p2822_p5, 1, 0 }
  0x2b   : > { %3634 = sst [smem:[#allocation36_spill]] %s3633_s23  ;;  %p2836_p7 = pneg %p2822_p5 }
  0x2c   : > { %s3636_s5 = sld [smem:[#allocation49_spill]] }
  0x32   : > { %s2253_s4 = scalar_lea.hbm %s3636_s5, 1024 }
  0x33   : > { %p2254_p6 = scmp.ne.s32.totalorder %s3636_s5, %s2253_s4  ;;  %p2260_p10 = scmp.lt.u32.totalorder %s2253_s4, %s3636_s5 }
  0x35   : > { %p2256_p8 = pnand %p2836_p7, %p2254_p6 }
  0x37   : > { %p2257_p9 = pneg %p2256_p8 }
  0x39   : > { %p2262_p11 = pnand %p2260_p10, %p2257_p9 }
  0x3b   : > { %2265 = shalt.err (!%p2262_p11)
}
  0x3c   : > { %s2266_s9 = scalar_lea.vmem %s405_s13, 1024  ;;  %p2274_p2 = scmp.lt.s32.totalorder %s405_s13, %s405_s13 }
  0x3d   : > { %p2267_p12 = scmp.ne.s32.totalorder %s405_s13, %s2266_s9  ;;  %p2275_p4 = scmp.lt.s32.totalorder %s2266_s9, %s2266_s9 }
  0x3f   : > { %p2269_p13 = pnand %p2267_p12, %p2836_p7  ;;  %p2276_p1 = por %p2275_p4, %p2274_p2 }
  0x41   : > { %p2270_p0 = pneg %p2269_p13 }
  0x43   : > { %p2277_p3 = pnand %p2276_p1, %p2270_p0 }
  0x45   : > { %2280 = shalt.err (!%p2277_p3)
}
  0x46   : > { %s3580_s2 = smov 64   ;;  %s3581_s3 = smov 4  }
  0x47   : > { %2021 = dma.hbm_to_vmem [thread:$0]  (!%p2822_p5), %s3636_s5, 1024, %s405_s13, [#allocation10], %s3580_s2, %s3580_s2, %s3581_s3  }
  0x48   : > { %s3638_s7 = sld [smem:[#allocation51_spill]] }
  0x4e   : > { %s2281_s25 = scalar_lea.hbm %s3638_s7, 1024 }
  0x4f   : > { %p2282_p1 = scmp.ne.s32.totalorder %s3638_s7, %s2281_s25  ;;  %p2288_p8 = scmp.lt.u32.totalorder %s2281_s25, %s3638_s7 }
  0x51   : > { %p2284_p3 = pnand %p2282_p1, %p2836_p7 }
  0x53   : > { %p2285_p6 = pneg %p2284_p3 }
  0x55   : > { %p2290_p9 = pnand %p2288_p8, %p2285_p6 }
  0x57   : > { %2293 = shalt.err (!%p2290_p9)
}
  0x58   : > { %s2294_s13 = scalar_lea.vmem %s2826_s10, 1024  ;;  %p2302_p13 = scmp.lt.s32.totalorder %s2826_s10, %s2826_s10 }
  0x59   : > { %p2295_p10 = scmp.ne.s32.totalorder %s2826_s10, %s2294_s13  ;;  %p2303_p0 = scmp.lt.s32.totalorder %s2294_s13, %s2294_s13 }
  0x5b   : > { %p2297_p11 = pnand %p2295_p10, %p2836_p7  ;;  %p2304_p2 = por %p2303_p0, %p2302_p13 }
  0x5d   : > { %p2298_p12 = pneg %p2297_p11 }
  0x5f   : > { %p2305_p4 = pnand %p2304_p2, %p2298_p12 }
  0x61   : > { %2308 = shalt.err (!%p2305_p4)
}
  0x62   : > { %2027 = dma.hbm_to_vmem [thread:$0]  (!%p2822_p5), %s3638_s7, 1024, %s2826_s10, [#allocation13], %s3580_s2, %s3580_s2, %s3581_s3  }
  0x63   : > { %s2882_s26 = sadd.s32 1, %s2641_s19  ;;  %s47_s27 = sadd.s32 1, %s2645_s20 }
  0x64   : > { %3639 = sst [smem:[#allocation37_spill]] %s2882_s26  ;;  %p45_p1 = scmp.ge.s32.totalorder %s2882_s26, 3 }
  0x65   : > { %p3595_p3 = scmp.eq.s32.totalorder %s2649_s21, 0  ;;  %s1782_s4 = sadd.s32 4294967295, %s2641_s19 }
  0x66   : > { %s90_s17 = sadd.s32 1, %s2617_s30  ;;  %s3731_s27 = smov (!%p45_p1, %s47_s27), %s2645_s20 }
  0x67   : > { %s2890_s23 = scalar_select %p45_p1, 0, %s2882_s26  }
  0x68   : > { %p80_p6 = scmp.gt.s32.totalorder %s1782_s4, 0  ;;  %p49_p8 = scmp.ge.s32.totalorder %s3731_s27, 2 }
  0x69   : > { %3640 = sst [smem:[#allocation38_spill]] %s2890_s23  ;;  %s52_s10 = ssub.s32 %s2641_s19, %s2890_s23 }
  0x6a   : > { %s1783_s18 = sadd.s32 4294967295, %s2890_s23  ;;  %s3733_s4 = smov (!%p80_p6, %s1782_s4), 0 }
  0x6b   : > { %s3735_s27 = smov (%p49_p8, %s3731_s27), 0  ;;  %p83_p9 = scmp.gt.s32.totalorder %s1783_s18, 0 }
  0x6c   : > { %3641 = sst [smem:[#allocation39_spill]] %s3735_s27  ;;  %p97_p10 = scmp.ne.s32.totalorder %s2617_s30, %s2613_s29 }
  0x6d   : > { %s2902_s9 = ssub.s32 %s2645_s20, %s3735_s27  ;;  %p103_p11 = scmp.ne.s32.totalorder %s2613_s29, %s2609_s28 }
  0x6e   : > { %s2907_s13 = sor.u32 %s52_s10, %s2902_s9  ;;  %p2911_p12 = por %p97_p10, %p3595_p3 }
  0x6f   : > { %3642 = sst [smem:[#allocation40_spill]] %s2907_s13  ;;  %p3644_p0 = scmp.eq.s32.totalorder %s2809_s22, 0 }
  0x70   : > { %s3737_s18 = smov (!%p83_p9, %s1783_s18), 0  ;;  %p3594_p4 = scmp.lt.s32.totalorder %s2649_s21, 6 }
  0x71   : > { %p2918_p2 = por %p103_p11, %p3644_p0  ;;  %s2924_s2 = smul.u32 6, %s2645_s20 }
  0x72   : > { %s86_s28 = ssub.s32 %s3733_s4, %s3737_s18  ;;  %s498_s3 = sand.u32 1, %s2649_s21  }
  0x73   : > { %s3645_s25 = scalar_select %p2918_p2, 1, 0 }
  0x74   : > { %s87_s10 = sor.u32 %s86_s28, %s2902_s9  ;;  %s500_s5 = sand.u32 1, %s2617_s30  }
  0x75   : > { %3646 = sst [smem:[#allocation41_spill]] %s3645_s25  ;;  %p88_p1 = scmp.eq.s32.totalorder %s87_s10, 0 }
  0x76   : > { %s1794_s27 = sshll.u32 %s500_s5, 4  ;;  %s1796_s29 = sshll.u32 %s3733_s4, 1 }
  0x77   : > { %s2930_s7 = scalar_select %p88_p1, %s2617_s30, %s90_s17  }
  0x78   : > { %s511_s23 = sadd.s32 %s2924_s2, %s1796_s29  ;;  %s502_s19 = scalar_lea.vmem [#allocation6], %s1794_s27 }
  0x79   : > { %3647 = sst [smem:[#allocation42_spill]] %s2930_s7  ;;  %s1797_s26 = sshll.u32 %s511_s23, 7 }
  0x7a   : > { %s514_s25 = sshll.u32 %s502_s19, 4  ;;  %s3648_s1 = sld [smem:[#allocation45_spill]]  ;;  %s2938_s25 = int_to_ptr.vmem [resolvable:$true] %s514_s25 }
  0x7b   : > { %p2944_p6 = pnand %p3594_p4, %p2911_p12  ;;  %s2655_s29 = smov [#allocation11]  }
  0x7c   : > { %s418_s19 = sshll.u32 %s2655_s29, 4  ;;  %s2950_s14 = scalar_lea.sflag [#allocation7], %s498_s3  ;;  %s2948_s19 = int_to_ptr.vmem [resolvable:$true] %s418_s19 }
  0x7d   : > { %p2311_p9 = pneg %p2944_p6 }
  0x80   : > { %s2936_s13 = scalar_lea.hbm %s3648_s1, %s1797_s26  ;;  %s2314_s4 = scalar_lea.hbm %s3648_s1, 1536 }
  0x81   : > { %s2309_s22 = scalar_lea.hbm %s2936_s13, 256  ;;  %p2315_p12 = scmp.lt.u32.totalorder %s2936_s13, %s3648_s1 }
  0x82   : > { %p2310_p8 = scmp.ne.s32.totalorder %s2936_s13, %s2309_s22  ;;  %p2316_p0 = scmp.lt.u32.totalorder %s2314_s4, %s2309_s22 }
  0x83   : > { %p2318_p4 = scmp.lt.u32.totalorder %s2309_s22, %s2936_s13 }
  0x84   : > { %p2312_p10 = pnand %p2311_p9, %p2310_p8  ;;  %p2317_p1 = por %p2316_p0, %p2315_p12 }
  0x86   : > { %p2313_p11 = pneg %p2312_p10  ;;  %p2319_p3 = por %p2318_p4, %p2317_p1 }
  0x88   : > { %p2320_p13 = pnand %p2319_p3, %p2313_p11 }
  0x8a   : > { %2323 = shalt.err (!%p2320_p13)
}
  0x8b   : > { %s2324_s3 = scalar_lea.vmem %s2938_s25, 256  ;;  %s2656_s18 = smov [#allocation6]  }
  0x8c   : > { %p2325_p8 = scmp.ne.s32.totalorder %s2938_s25, %s2324_s3  ;;  %s2329_s0 = sshll.u32 %s2656_s18, 4  ;;  %s2330_s0 = int_to_ptr.vmem [resolvable:$false] %s2329_s0 }
  0x8d   : > { %s2331_s28 = scalar_lea.vmem %s2330_s0, 512  ;;  %p2332_p5 = scmp.lt.s32.totalorder %s2938_s25, %s2330_s0 }
  0x8e   : > { %p2327_p10 = pnand %p2325_p8, %p2311_p9  ;;  %p2333_p12 = scmp.lt.s32.totalorder %s2331_s28, %s2324_s3 }
  0x90   : > { %p2328_p2 = pneg %p2327_p10  ;;  %p2334_p0 = por %p2333_p12, %p2332_p5 }
  0x92   : > { %p2335_p4 = pnand %p2334_p0, %p2328_p2 }
  0x94   : > { %2338 = shalt.err (!%p2335_p4)
}
  0x95   : > { %s3599_s10 = smov 128   ;;  %s3601_s29 = smov 8  }
  0x96   : > { %2040 = dma.hbm_to_vmem [thread:$0]  (!%p2944_p6), %s2936_s13, 256, %s2938_s25, %s2950_s14, %s3599_s10, %s3599_s10, %s3601_s29  }
  0x97   : > { %s3650_s6 = sld [smem:[#allocation50_spill]] }
  0x9d   : > { %s2339_s27 = scalar_lea.hbm %s3650_s6, 16 }
  0x9e   : > { %p2340_p5 = scmp.ne.s32.totalorder %s3650_s6, %s2339_s27  ;;  %p2346_p2 = scmp.lt.u32.totalorder %s2339_s27, %s3650_s6 }
  0xa0   : > { %p2342_p3 = pnand %p2340_p5, %p2836_p7 }
  0xa2   : > { %p2343_p13 = pneg %p2342_p3 }
  0xa4   : > { %p2348_p9 = pnand %p2346_p2, %p2343_p13 }
  0xa6   : > { %2351 = shalt.err (!%p2348_p9)
}
  0xa7   : > { %s2352_s13 = scalar_lea.vmem %s2948_s19, 16  ;;  %s2359_s25 = scalar_lea.vmem %s2948_s19, 32 }
  0xa8   : > { %p2353_p6 = scmp.ne.s32.totalorder %s2948_s19, %s2352_s13  ;;  %p2360_p8 = scmp.lt.s32.totalorder %s2948_s19, %s2948_s19 }
  0xa9   : > { %p2361_p10 = scmp.lt.s32.totalorder %s2359_s25, %s2352_s13 }
  0xaa   : > { %p2355_p11 = pnand %p2353_p6, %p2836_p7 }
  0xab   : > { %p2362_p12 = por %p2361_p10, %p2360_p8 }
  0xac   : > { %p2356_p1 = pneg %p2355_p11 }
  0xae   : > { %p2363_p0 = pnand %p2362_p12, %p2356_p1 }
  0xb0   : > { %2366 = shalt.err (!%p2363_p0)
}
  0xb1   : > { %p3651_p4 = scmp.ne.s32.totalorder %s3635_s12, 0  ;;  %s2659_s0 = smov [#allocation14]  }
  0xb2   : > { %s442_s28 = sshll.u32 %s2659_s0, 4  ;;  %s2660_s22 = smov [#allocation15]   ;;  %s443_s28 = int_to_ptr.vmem [resolvable:$true] %s442_s28 }
  0xb3   : > { %2024 = dma.hbm_to_vmem [thread:$0]  (!%p3651_p4), %s3650_s6, 16, %s2948_s19, [#allocation10]  }
  0xb4   : > { %s458_s26 = sshll.u32 %s2660_s22, 4  ;;  %s3652_s8 = sld [smem:[#allocation52_spill]]  ;;  %s459_s26 = int_to_ptr.vmem [resolvable:$true] %s458_s26 }
  0xba   : > { %s2367_s17 = scalar_lea.hbm %s3652_s8, 16 }
  0xbb   : > { %p2368_p5 = scmp.ne.s32.totalorder %s3652_s8, %s2367_s17  ;;  %p2374_p2 = scmp.lt.u32.totalorder %s2367_s17, %s3652_s8 }
  0xbd   : > { %p2370_p3 = pnand %p2368_p5, %p2836_p7 }
  0xbf   : > { %p2371_p13 = pneg %p2370_p3 }
  0xc1   : > { %p2376_p9 = pnand %p2374_p2, %p2371_p13 }
  0xc3   : > { %2379 = shalt.err (!%p2376_p9)
}
  0xc4   : > { %s2380_s19 = scalar_lea.vmem %s443_s28, 16  ;;  %s2387_s5 = scalar_lea.vmem %s443_s28, 32 }
  0xc5   : > { %p2381_p6 = scmp.ne.s32.totalorder %s443_s28, %s2380_s19  ;;  %p2388_p8 = scmp.lt.s32.totalorder %s443_s28, %s443_s28 }
  0xc6   : > { %p2389_p10 = scmp.lt.s32.totalorder %s2387_s5, %s2380_s19 }
  0xc7   : > { %p2383_p11 = pnand %p2381_p6, %p2836_p7 }
  0xc8   : > { %p2390_p12 = por %p2389_p10, %p2388_p8 }
  0xc9   : > { %p2384_p1 = pneg %p2383_p11 }
  0xcb   : > { %p2391_p0 = pnand %p2390_p12, %p2384_p1 }
  0xcd   : > { %2394 = shalt.err (!%p2391_p0)
}
  0xce   : > { %2030 = dma.hbm_to_vmem [thread:$0]  (!%p3651_p4), %s3652_s8, 16, %s443_s28, [#allocation13]  }
  0xcf   : > { %s3653_s11 = sld [smem:[#allocation55_spill]] }
  0xd5   : > { %s2395_s4 = scalar_lea.hbm %s3653_s11, 1024 }
  0xd6   : > { %p2396_p5 = scmp.ne.s32.totalorder %s3653_s11, %s2395_s4  ;;  %p2402_p2 = scmp.lt.u32.totalorder %s2395_s4, %s3653_s11 }
  0xd8   : > { %p2398_p3 = pnand %p2396_p5, %p2836_p7 }
  0xda   : > { %p2399_p13 = pneg %p2398_p3 }
  0xdc   : > { %p2404_p9 = pnand %p2402_p2, %p2399_p13 }
  0xde   : > { %2407 = shalt.err (!%p2404_p9)
}
  0xdf   : > { %s2408_s25 = scalar_lea.vmem %s459_s26, 1024  ;;  %p2416_p8 = scmp.lt.s32.totalorder %s459_s26, %s459_s26 }
  0xe0   : > { %p2409_p6 = scmp.ne.s32.totalorder %s459_s26, %s2408_s25  ;;  %p2417_p10 = scmp.lt.s32.totalorder %s2408_s25, %s2408_s25 }
  0xe2   : > { %p2411_p11 = pnand %p2409_p6, %p2836_p7  ;;  %p2418_p12 = por %p2417_p10, %p2416_p8 }
  0xe4   : > { %p2412_p1 = pneg %p2411_p11 }
  0xe6   : > { %p2419_p0 = pnand %p2418_p12, %p2412_p1 }
  0xe8   : > { %2422 = shalt.err (!%p2419_p0)
}
  0xe9   : > { %s3654_s28 = smov 4   ;;  %s3655_s19 = smov 64  }
  0xea   : > { %s3656_s24 = sld [smem:[#allocation40_spill]]  ;;  %s3657_s0 = sld [smem:[#allocation29_spill]] }
  0xeb   : > { %s3658_s22 = sld [smem:[#allocation35_spill]]  ;;  %s3659_s27 = sld [smem:[#allocation33_spill]] }
  0xec   : > { %2033 = dma.hbm_to_vmem [thread:$0]  (!%p3651_p4), %s3653_s11, 1024, %s459_s26, [#allocation16], %s3655_s19, %s3655_s19, %s3654_s28  }
  0xed   : > { %s1781_s12 = sadd.s32 4294967294, %s2649_s21   ;;  %s56_s4 = sadd.s32 1, %s2629_s16 }
  0xee   : > { %p63_p7 = scmp.ne.s32.totalorder %s2629_s16, %s2625_s15  ;;  %p3662_p3 = scmp.eq.s32.totalorder %s2649_s21, 0 }
  0xef   : > { %p379_p6 = scmp.eq.s32.totalorder %s1781_s12, 5  ;;  %s475_s26 = sand.u32 1, %s2629_s16  }
  0xf0   : > { %p3660_p5 = scmp.eq.s32.totalorder %s3656_s24, 0  ;;  %p3055_p13 = por %p3662_p3, %p63_p7 }
  0xf1   : > { %p69_p2 = scmp.ne.s32.totalorder %s2625_s15, %s3657_s0  ;;  %p373_p9 = scmp.eq.s32.totalorder %s3658_s22, 5 }
  0xf2   : > { %s3051_s17 = scalar_select %p3660_p5, %s2629_s16, %s56_s4  }
  0xf3   : > { %p3664_p11 = scmp.eq.s32.totalorder %s3658_s22, 0  ;;  %p3069_p4 = por %p373_p9, %p63_p7 }
  0xf4   : > { %3661 = sst [smem:[#allocation43_spill]] %s3051_s17  ;;  %p3073_p8 = por %p379_p6, %p69_p2 }
  0xf5   : > { %p3064_p1 = por %p3664_p11, %p69_p2  ;;  %s1791_s28 = sshll.u32 %s475_s26, 4 }
  0xf6   : > { %s3666_s13 = scalar_select %p3069_p4, 1, 0 }
  0xf7   : > { %s3667_s25 = scalar_select %p3073_p8, 1, 0 }
  0xf8   : > { %s1792_s19 = sshll.u32 %s3659_s27, 1  ;;  %s479_s18 = scalar_lea.vmem [#allocation3], %s1791_s28 }
  0xf9   : > { %s485_s5 = sadd.s32 %s2924_s2, %s1792_s19  ;;  %s488_s24 = sshll.u32 %s479_s18, 4  ;;  %s3079_s24 = int_to_ptr.vmem [resolvable:$true] %s488_s24 }
  0xfa   : > { %s1793_s0 = sshll.u32 %s485_s5, 7  ;;  %s3668_s10 = sld [smem:[#allocation44_spill]] }
  0xfb   : > { %p3669_p10 = scmp.lt.s32.totalorder %s2649_s21, 6  ;;  %s3094_s27 = scalar_lea.sflag [#allocation4], %s475_s26 }
  0xfd   : > { %p3090_p12 = pnand %p3669_p10, %p3055_p13 }
  0xff   : > { %p2425_p7 = pneg %p3090_p12 }
 0x100   : > { %s3084_s29 = scalar_lea.hbm %s3668_s10, %s1793_s0  ;;  %s2428_s5 = scalar_lea.hbm %s3668_s10, 1536 }
 0x101   : > { %s2423_s28 = scalar_lea.hbm %s3084_s29, 256  ;;  %p2429_p13 = scmp.lt.u32.totalorder %s3084_s29, %s3668_s10 }
 0x102   : > { %p2424_p0 = scmp.ne.s32.totalorder %s3084_s29, %s2423_s28  ;;  %p2430_p2 = scmp.lt.u32.totalorder %s2428_s5, %s2423_s28 }
 0x103   : > { %p2432_p6 = scmp.lt.u32.totalorder %s2423_s28, %s3084_s29 }
 0x104   : > { %p2426_p5 = pnand %p2425_p7, %p2424_p0  ;;  %p2431_p9 = por %p2430_p2, %p2429_p13 }
 0x106   : > { %p2427_p3 = pneg %p2426_p5  ;;  %p2433_p11 = por %p2432_p6, %p2431_p9 }
 0x108   : > { %p2434_p10 = pnand %p2433_p11, %p2427_p3 }
 0x10a   : > { %2437 = shalt.err (!%p2434_p10)
}
 0x10b   : > { %s2438_s26 = scalar_lea.vmem %s3079_s24, 256  ;;  %s2661_s12 = smov [#allocation3]  }
 0x10c   : > { %p2439_p0 = scmp.ne.s32.totalorder %s3079_s24, %s2438_s26  ;;  %s2443_s4 = sshll.u32 %s2661_s12, 4  ;;  %s2444_s4 = int_to_ptr.vmem [resolvable:$false] %s2443_s4 }
 0x10d   : > { %s2445_s23 = scalar_lea.vmem %s2444_s4, 512  ;;  %p2446_p4 = scmp.lt.s32.totalorder %s3079_s24, %s2444_s4 }
 0x10e   : > { %p2441_p5 = pnand %p2439_p0, %p2425_p7  ;;  %p2447_p13 = scmp.lt.s32.totalorder %s2445_s23, %s2438_s26 }
 0x110   : > { %p2442_p8 = pneg %p2441_p5  ;;  %p2448_p2 = por %p2447_p13, %p2446_p4 }
 0x112   : > { %p2449_p9 = pnand %p2448_p2, %p2442_p8 }
 0x114   : > { %2452 = shalt.err (!%p2449_p9)
}
 0x115   : > { %s3671_s28 = smov 8   ;;  %s3672_s19 = smov 128  }
 0x116   : > { %s3673_s5 = sld [smem:[#allocation37_spill]]  ;;  %s3674_s18 = sld [smem:[#allocation38_spill]] }
 0x117   : > { %s3675_s0 = sld [smem:[#allocation27_spill]]  ;;  %s3676_s12 = sld [smem:[#allocation26_spill]] }
 0x118   : > { %s3677_s6 = sld [smem:[#allocation25_spill]]  ;;  %p3678_p6 = scmp.eq.s32.totalorder %s2649_s21, 0 }
 0x119   : > { %2037 = dma.hbm_to_vmem [thread:$0]  (!%p3090_p12), %s3084_s29, 256, %s3079_s24, %s3094_s27, %s3672_s19, %s3672_s19, %s3671_s28  }
 0x11a   : > { %p3680_p10 = scmp.eq.s32.totalorder %s3658_s22, 0  ;;  %s3682_s17 = sld [smem:[#allocation46_spill]] }
 0x11b   : > { %p3684_p5 = scmp.lt.s32.totalorder %s2649_s21, 6 }
 0x11c   : > { %p114_p4 = scmp.lt.s32.totalorder %s3673_s5, 2  ;;  %s116_s1 = sadd.s32 1, %s3674_s18 }
 0x11d   : > { %s124_s26 = sadd.s32 1, %s3675_s0  ;;  %p117_p8 = scmp.lt.s32.totalorder %s116_s1, 2 }
 0x11e   : > { %s3739_s5 = smov (!%p114_p4, %s3673_s5), 2  ;;  %p131_p7 = scmp.ne.s32.totalorder %s3675_s0, %s3676_s12 }
 0x11f   : > { %p137_p3 = scmp.ne.s32.totalorder %s3676_s12, %s3677_s6  ;;  %s526_s4 = sand.u32 1, %s3675_s0  }
 0x120   : > { %s3741_s1 = smov (!%p117_p8, %s116_s1), 2  ;;  %p3136_p11 = por %p131_p7, %p3678_p6 }
 0x121   : > { %p3142_p12 = por %p137_p3, %p3680_p10  ;;  %s120_s24 = ssub.s32 %s3739_s5, %s3741_s1 }
 0x122   : > { %s1798_s27 = sshll.u32 %s526_s4, 4  ;;  %s121_s18 = sor.u32 %s120_s24, %s2902_s9 }
 0x123   : > { %s3681_s29 = scalar_select %p3142_p12, 1, 0 }
 0x124   : > { %p122_p0 = scmp.eq.s32.totalorder %s121_s18, 0  ;;  %s1799_s8 = sshll.u32 %s3739_s5, 1 }
 0x125   : > { %s537_s6 = sadd.s32 %s2924_s2, %s1799_s8  ;;  %s528_s12 = scalar_lea.vmem [#allocation8], %s1798_s27 }
 0x126   : > { %s540_s10 = sshll.u32 %s528_s12, 4  ;;  %s3743_s0 = smov (!%p122_p0, %s3675_s0), %s124_s26  ;;  %s3151_s10 = int_to_ptr.vmem [resolvable:$true] %s540_s10 }
 0x127   : > { %s1800_s11 = sshll.u32 %s537_s6, 7  ;;  %s3683_s7 = smov %s3682_s17 }
 0x128   : > { %s3156_s16 = scalar_lea.hbm %s3682_s17, %s1800_s11  ;;  %p3162_p13 = pnand %p3684_p5, %p3136_p11 }
 0x129   : > { %s2453_s2 = scalar_lea.hbm %s3156_s16, 256  ;;  %s2458_s9 = scalar_lea.hbm %s3683_s7, 1536 }
 0x12a   : > { %p2454_p2 = scmp.ne.s32.totalorder %s3156_s16, %s2453_s2  ;;  %p2455_p9 = pneg %p3162_p13 }
 0x12b   : > { %p2459_p7 = scmp.lt.u32.totalorder %s3156_s16, %s3683_s7  ;;  %p2460_p3 = scmp.lt.u32.totalorder %s2458_s9, %s2453_s2 }
 0x12c   : > { %p2456_p4 = pnand %p2455_p9, %p2454_p2  ;;  %p2462_p11 = scmp.lt.u32.totalorder %s2453_s2, %s3156_s16 }
 0x12d   : > { %p2461_p6 = por %p2460_p3, %p2459_p7 }
 0x12e   : > { %p2457_p8 = pneg %p2456_p4 }
 0x12f   : > { %p2463_p10 = por %p2462_p11, %p2461_p6 }
 0x131   : > { %p2464_p0 = pnand %p2463_p10, %p2457_p8 }
 0x133   : > { %2467 = shalt.err (!%p2464_p0)
}
 0x134   : > { %s2468_s1 = scalar_lea.vmem %s3151_s10, 256  ;;  %s2662_s26 = smov [#allocation8]  }
 0x135   : > { %p2469_p5 = scmp.ne.s32.totalorder %s3151_s10, %s2468_s1  ;;  %s2473_s4 = sshll.u32 %s2662_s26, 4  ;;  %s2474_s4 = int_to_ptr.vmem [resolvable:$false] %s2473_s4 }
 0x136   : > { %s2475_s23 = scalar_lea.vmem %s2474_s4, 512  ;;  %p2476_p12 = scmp.lt.s32.totalorder %s3151_s10, %s2474_s4 }
 0x137   : > { %p2471_p2 = pnand %p2469_p5, %p2455_p9  ;;  %p2477_p7 = scmp.lt.s32.totalorder %s2475_s23, %s2468_s1 }
 0x139   : > { %p2472_p4 = pneg %p2471_p2  ;;  %p2478_p3 = por %p2477_p7, %p2476_p12 }
 0x13b   : > { %p2479_p6 = pnand %p2478_p3, %p2472_p4 }
 0x13d   : > { %2482 = shalt.err (!%p2479_p6)
}
 0x13e   : > { %2043 = dma.hbm_to_vmem [thread:$0]  (!%p3162_p13), %s3156_s16, 256, %s3151_s10, %s2950_s14, %s3672_s19, %s3672_s19, %s3671_s28  }
 0x13f   : > { %s3686_s24 = sld [smem:[#allocation36_spill]] }
 0x145   : > { %p3687_p9 = scmp.ne.s32.totalorder %s3686_s24, 0 }
 0x146   : > { %s3198_s27 = sand.u32 (!%p3687_p9), 1, %s2625_s15  }
 0x147   : > { %552 = sbr.rel (%p3687_p9) target bundleno = 1130 (0x46a), region = 72  ;;  %s1802_s18 = sshll.u32 (!%p3687_p9), %s3198_s27, 4 }
 0x148   : > { %s555_s6 = scalar_lea.sflag (!%p3687_p9), [#allocation4], %s3198_s27  ;;  %s3204_s12 = scalar_lea.vmem (!%p3687_p9), [#allocation3], %s1802_s18 }
 0x14e   : > { %2568 = dma.done.wait (%p3064_p1), %s555_s6, 256  }
 0x14f   : > { %2570 = vsyncadd (%p3064_p1), %s555_s6, 4294967040  ;;  %s3688_s16 = sld [smem:[#allocation35_spill]]  ;;  %s3689_s14 = sld [smem:[#allocation28_spill]] }
 0x150   : > { %s3690_s10 = sld [smem:[#allocation41_spill]] }
 0x155   : > { %s563_s28 = sand.u32 1, %s3688_s16   ;;  %s565_s19 = sand.u32 1, %s3689_s14  }
 0x156   : > { %s1803_s22 = sshll.u32 %s565_s19, 4  ;;  %s564_s8 = scalar_lea.sflag [#allocation7], %s563_s28 }
 0x157   : > { %s567_s2 = scalar_lea.vmem [#allocation6], %s1803_s22  ;;  %p3691_p12 = scmp.ne.s32.totalorder %s3690_s10, 0 }
 0x159   : > { %2572 = dma.done.wait (%p3691_p12), %s564_s8, 256  }
 0x15a   : > { %2574 = vsyncadd (%p3691_p12), %s564_s8, 4294967040  ;;  %s3692_s11 = sld [smem:[#allocation26_spill]]  ;;  %p3693_p1 = scmp.ne.s32.totalorder %s3681_s29, 0 }
 0x160   : > { %s574_s20 = sand.u32 1, %s3692_s11  }
 0x161   : > { %s3217_s9 = sshll.u32 %s574_s20, 4 }
 0x162   : > { %s576_s3 = scalar_lea.vmem [#allocation8], %s3217_s9 }
 0x163   : > { %2576 = dma.done.wait (%p3693_p1), %s564_s8, 256  }
 0x164   : > { %2578 = vsyncadd (%p3693_p1), %s564_s8, 4294967040  ;;  %p3694_p13 = scmp.eq.s32.totalorder %s3688_s16, 0 }
 0x166   : > { %2580 = dma.done.wait (%p3694_p13), [#allocation10], 1040   ;;  %p3695_p8 = pmov %p3694_p13 }
 0x168   : > { %2582 = vsyncadd (%p3695_p8), [#allocation10], 4294966256  ;;  %p3696_p11 = pmov %p3695_p8 }
 0x169   : > { %p3697_p10 = pmov %p3695_p8 }
 0x16a   : > { %2584 = dma.done.wait (%p3696_p11), [#allocation13], 1040  }
 0x16b   : > { %2586 = vsyncadd (%p3697_p10), [#allocation13], 4294966256  ;;  %p3698_p0 = pmov %p3695_p8 }
 0x16d   : > { %2588 = dma.done.wait (%p3698_p0), [#allocation16], 1024   ;;  %p3699_p5 = pmov %p3698_p0 }
 0x16e   : > { %v2663_v0 = vmov 0.0   ;;  %v3238_v1 = vld [vmem:[%s567_s2] sm:$0xff]  ;;  %v3240_v2 = vld [vmem:[%s567_s2 + $0x8] sm:$0xff]  ;;  %vm2664_vm0 = vmmov 0   ;;  %s3700_s5 = sld [smem:[#allocation47_spill]]  ;;  %s3701_s4 = sld [smem:[#allocation48_spill]] }
 0x16f   : > { %2590 = vsyncadd (%p3699_p5), [#allocation16], 4294966272  ;;  %1910 = vmatprep.subr.bf16.mxu0 %v2663_v0  ;;  %1938 = vmatprep.subr.bf16.mxu1 %v2663_v0  ;;  %v684_v3 = vmul.f32 %v3238_v1, %v3238_v1  ;;  %v685_v4 = vmul.f32 %v3240_v2, %v3240_v2  ;;  %v3248_v5 = vld [vmem:[%s3204_s12] sm:$0xff]  ;;  %v3252_v6 = vld [vmem:[%s3204_s12 + $0x8] sm:$0xff]  ;;  %s3702_s23 = sld [smem:[#allocation31_spill]]  ;;  %s3703_s14 = sld [smem:[#allocation53_spill]] }
 0x170   : > { %666 = vadd.xlane.f32.xlu0 %v3238_v1  ;;  %v686_v7 = vmul.f32 %v3248_v5, %v3248_v5  ;;  %v687_v8 = vmul.f32 %v3252_v6, %v3252_v6  ;;  %v3260_v9 = vld [vmem:[%s576_s3] sm:$0xff]  ;;  %v3262_v12 = vld [vmem:[%s576_s3 + $0x8] sm:$0xff]  ;;  %1926 = vmatprep.mubr.msk.bf16.mxu0 %vm2664_vm0, %v2663_v0  ;;  %s3707_s22 = sld [smem:[#allocation54_spill]]  ;;  %s3708_s8 = sld [smem:[#allocation32_spill]] }
 0x171   : > { %690 = vadd.xlane.f32.xlu1 %v684_v3  ;;  %v2185_v10 = vld [vmem:[#allocation9] sm:$0xff]   ;;  %v688_v13 = vmul.f32 %v3260_v9, %v3260_v9  ;;  %v2187_v14 = vld [vmem:[#allocation9 + $0x8] sm:$0xff]   ;;  %v689_v16 = vmul.f32 %v3262_v12, %v3262_v12  ;;  %v2189_v17 = vld [vmem:[#allocation9 + $0x10] sm:$0xff]   ;;  %1954 = vmatprep.mubr.msk.bf16.mxu1 %vm2664_vm0, %v2663_v0  ;;  %s3709_s29 = sld [smem:[#allocation56_spill]]  ;;  %s648_s17 = scalar_lea.vmem [#allocation17], %s1802_s18 }
 0x172   : > { %v2186_v11 = vld [vmem:[#allocation12] sm:$0xff]   ;;  %1911 = vmatpush3.bf16.msra.mxu0 %v2185_v10  ;;  %v2188_v15 = vld [vmem:[#allocation12 + $0x8] sm:$0xff]   ;;  %v2190_v18 = vld [vmem:[#allocation12 + $0x10] sm:$0xff]   ;;  %s1578_s18 = scalar_lea.sflag [#allocation5], %s3198_s27  ;;  %p3711_p4 = scmp.ne.s32.totalorder %s3666_s13, 0 }
 0x173   : > { %1939 = vmatpush3.bf16.msra.mxu1 %v2186_v11  ;;  %1912 = vmatprep.subr.bf16.mxu0 %v2663_v0  ;;  %v2191_v19 = vld [vmem:[#allocation9 + $0x18] sm:$0xff]   ;;  %v2193_v21 = vld [vmem:[#allocation9 + $0x20] sm:$0xff]   ;;  %v2195_v23 = vld [vmem:[#allocation9 + $0x28] sm:$0xff]   ;;  %s2665_s12 = smov [#allocation17]  }
 0x174   : > { %668 = vadd.xlane.f32.xlu0 %v3240_v2  ;;  %1940 = vmatprep.subr.bf16.mxu1 %v2663_v0  ;;  %v2192_v20 = vld [vmem:[#allocation12 + $0x18] sm:$0xff]   ;;  %v2194_v22 = vld [vmem:[#allocation12 + $0x20] sm:$0xff]   ;;  %v2196_v24 = vld [vmem:[#allocation12 + $0x28] sm:$0xff]   ;;  %s2487_s16 = sshll.u32 %s2665_s12, 4  ;;  %s2488_s16 = int_to_ptr.vmem [resolvable:$false] %s2487_s16 }
 0x175   : > { %692 = vadd.xlane.f32.xlu1 %v685_v4  ;;  %v2197_v25 = vld [vmem:[#allocation9 + $0x30] sm:$0xff]   ;;  %v2199_v27 = vld [vmem:[#allocation9 + $0x38] sm:$0xff]   ;;  %s1831_s24 = sshll.u32 %s3702_s23, 4  ;;  %s3704_s10 = smov %s3703_s14 }
 0x176   : > { %1913 = vmatpush3.bf16.msra.mxu0 %v2187_v14  ;;  %v2198_v26 = vld [vmem:[#allocation12 + $0x30] sm:$0xff]   ;;  %v2200_v28 = vld [vmem:[#allocation12 + $0x38] sm:$0xff]   ;;  %s1832_s6 = sadd.s32 4294967280, %s1831_s24  ;;  %s1989_s2 = smul.u32 6, %s3708_s8 }
 0x177   : > { %1941 = vmatpush3.bf16.msra.mxu1 %v2188_v15  ;;  %1914 = vmatprep.subr.bf16.mxu0 %v2663_v0  ;;  %s1875_s11 = sshll.u32 %s3702_s23, 1 }
 0x178   : > { %670 = vadd.xlane.f32.xlu0 %v3248_v5  ;;  %1942 = vmatprep.subr.bf16.mxu1 %v2663_v0  ;;  %s1590_s20 = sadd.s32 %s1989_s2, %s1875_s11 }
 0x179   : > { %672 = vadd.xlane.f32.xlu1 %v3252_v6  ;;  %s1876_s1 = sshll.u32 %s1590_s20, 7 }
 0x17a   : > { %1915 = vmatpush3.bf16.msra.mxu0 %v2189_v17 }
 0x17b   : > { %1943 = vmatpush3.bf16.msra.mxu1 %v2190_v18  ;;  %1916 = vmatprep.subr.bf16.mxu0 %v2663_v0 }
 0x17c   : > { %694 = vadd.xlane.f32.xlu0 %v686_v7  ;;  %1944 = vmatprep.subr.bf16.mxu1 %v2663_v0 }
 0x17d   : > { %696 = vadd.xlane.f32.xlu1 %v687_v8  ;;  %v1811_v8 = vld [vmem:[%s3700_s5] ss:$0 sm:$0xff]  ;;  %s1593_s5 = sshll.u32 %s648_s17, 4  ;;  %s3473_s5 = int_to_ptr.vmem [resolvable:$true] %s1593_s5 }
 0x17e   : > { %1917 = vmatpush3.bf16.msra.mxu0 %v2191_v19  ;;  %p2490_p6 = scmp.lt.s32.totalorder %s3473_s5, %s2488_s16 }
 0x17f   : > { %1945 = vmatpush3.bf16.msra.mxu1 %v2192_v20  ;;  %1918 = vmatprep.subr.bf16.mxu0 %v2663_v0  ;;  %v1812_v20 = vld [vmem:[%s3701_s4] ss:$0 sm:$0xff]  ;;  %s3710_s4 = sld [smem:[#allocation57_spill]] }
 0x180   : > { %674 = vadd.xlane.f32.xlu0 %v3260_v9  ;;  %1946 = vmatprep.subr.bf16.mxu1 %v2663_v0 }
 0x181   : > { %676 = vadd.xlane.f32.xlu1 %v3262_v12 }
 0x182   : > { %1919 = vmatpush3.bf16.msra.mxu0 %v2193_v21 }
 0x183   : > { %1947 = vmatpush3.bf16.msra.mxu1 %v2194_v22  ;;  %1920 = vmatprep.subr.bf16.mxu0 %v2663_v0 }
 0x184   : > { %698 = vadd.xlane.f32.xlu0 %v688_v13  ;;  %1948 = vmatprep.subr.bf16.mxu1 %v2663_v0 }
 0x185   : > { %700 = vadd.xlane.f32.xlu1 %v689_v16  ;;  %s3478_s24 = scalar_lea.hbm %s3710_s4, %s1876_s1 }
 0x186   : > { %1921 = vmatpush3.bf16.msra.mxu0 %v2195_v23 }
 0x187   : > { %1949 = vmatpush3.bf16.msra.mxu1 %v2196_v24  ;;  %1922 = vmatprep.subr.bf16.mxu0 %v2663_v0 }
 0x188   : > { %1950 = vmatprep.subr.bf16.mxu1 %v2663_v0 }
 0x18a   : > { %1923 = vmatpush3.bf16.msra.mxu0 %v2197_v25 }
 0x18b   : > { %1951 = vmatpush3.bf16.msra.mxu1 %v2198_v26  ;;  %1924 = vmatprep.subr.bf16.mxu0 %v2663_v0 }
 0x18c   : > { %1952 = vmatprep.subr.bf16.mxu1 %v2663_v0 }
 0x18e   : > { %1925 = vmatpush3.bf16.msra.mxu0 %v2199_v27 }
 0x18f   : > { %1953 = vmatpush3.bf16.msra.mxu1 %v2200_v28  ;;  %1966 = vmatprep.subr.bf16.mxu0 %v2663_v0 }
 0x1fd   : > { %v667_v29 = vpop.xlane.xlu0 %666 }
 0x1fe   : > { %v678_v30 = vmul.f32 0.03125, %v667_v29  ;;  %v691_v31 = vpop.xlane.xlu1 %690 }
 0x1ff   : > { %v702_v33 = vmul.f32 0.03125, %v691_v31 }
 0x200   : > { %v708_v32 = vmul.f32 %v678_v30, %v678_v30  ;;  %v720_v58 = vsub.f32 %v3238_v1, %v678_v30 }
 0x201   : > { %v669_v34 = vpop.xlane.xlu0 %668 }
 0x202   : > { %v714_v35 = vsub.f32 %v702_v33, %v708_v32  ;;  %v679_v36 = vmul.f32 0.03125, %v669_v34  ;;  %v693_v37 = vpop.xlane.xlu1 %692 }
 0x203   : > { %v703_v40 = vmul.f32 0.03125, %v693_v37 }
 0x204   : > { %v726_v38 = vadd.f32 1e-05, %v714_v35  ;;  %v709_v39 = vmul.f32 %v679_v36, %v679_v36  ;;  %v721_v10 = vsub.f32 %v3240_v2, %v679_v36 }
 0x205   : > { %v671_v41 = vpop.xlane.xlu0 %670 }
 0x206   : > { %2209 = vrsqrt.f32 %v726_v38  ;;  %v715_v42 = vsub.f32 %v703_v40, %v709_v39  ;;  %v680_v43 = vmul.f32 0.03125, %v671_v41  ;;  %v673_v44 = vpop.xlane.xlu1 %672 }
 0x207   : > { %v681_v47 = vmul.f32 0.03125, %v673_v44  ;;  %v2202_v44 = vld [vmem:[#allocation15 + $0x8] sm:$0xff]  }
 0x208   : > { %v727_v45 = vadd.f32 1e-05, %v715_v42  ;;  %v710_v46 = vmul.f32 %v680_v43, %v680_v43  ;;  %v722_v23 = vsub.f32 %v3248_v5, %v680_v43  ;;  %v2201_v43 = vld [vmem:[#allocation15] sm:$0xff]  }
 0x209   : > { %v695_v48 = vpop.xlane.xlu0 %694  ;;  %v711_v51 = vmul.f32 %v681_v47, %v681_v47  ;;  %v723_v26 = vsub.f32 %v3252_v6, %v681_v47  ;;  %v2205_v47 = vld [vmem:[#allocation15 + $0x20] sm:$0xff]  }
 0x20a   : > { %2211 = vrsqrt.f32 %v727_v45  ;;  %v704_v49 = vmul.f32 0.03125, %v695_v48  ;;  %v697_v50 = vpop.xlane.xlu1 %696  ;;  %v2203_v45 = vld [vmem:[#allocation15 + $0x10] sm:$0xff]   ;;  %v2206_v48 = vld [vmem:[#allocation15 + $0x28] sm:$0xff]  }
 0x20b   : > { %v705_v53 = vmul.f32 0.03125, %v697_v50  ;;  %v2208_v50 = vld [vmem:[#allocation15 + $0x38] sm:$0xff]  }
 0x20c   : > { %v716_v52 = vsub.f32 %v704_v49, %v710_v46  ;;  %v2204_v46 = vld [vmem:[#allocation15 + $0x18] sm:$0xff]   ;;  %v2207_v49 = vld [vmem:[#allocation15 + $0x30] sm:$0xff]  }
 0x20d   : > { %v675_v54 = vpop.xlane.xlu0 %674  ;;  %v717_v56 = vsub.f32 %v705_v53, %v711_v51  ;;  %v1822_v51 = vld [vmem:[#allocation14] ss:$0 sm:$0xff] }
 0x20e   : > { %v728_v55 = vadd.f32 1e-05, %v716_v52  ;;  %v682_v57 = vmul.f32 0.03125, %v675_v54  ;;  %v677_v59 = vpop.xlane.xlu1 %676 }
 0x20f   : > { %v729_v61 = vadd.f32 1e-05, %v717_v56  ;;  %v683_v63 = vmul.f32 0.03125, %v677_v59 }
 0x210   : > { %v2210_v60 = vpop.eup %2209  ;;  %2213 = vrsqrt.f32 %v728_v55  ;;  %v712_v62 = vmul.f32 %v682_v57, %v682_v57  ;;  %v724_v5 = vsub.f32 %v3260_v9, %v682_v57 }
 0x211   : > { %v699_v3 = vpop.xlane.xlu0 %698  ;;  %v738_v4 = vmul.f32 %v2210_v60, %v720_v58  ;;  %2215 = vrsqrt.f32 %v729_v61  ;;  %v713_v11 = vmul.f32 %v683_v63, %v683_v63  ;;  %v725_v33 = vsub.f32 %v3262_v12, %v683_v63 }
 0x212   : > { %v706_v7 = vmul.f32 0.03125, %v699_v3  ;;  %v701_v13 = vpop.xlane.xlu1 %700 }
 0x213   : > { %v707_v15 = vmul.f32 0.03125, %v701_v13  ;;  %v751_v17 = vmul.f32 %v1811_v8, %v738_v4 }
 0x214   : > { %v2212_v14 = vpop.eup %2211  ;;  %v718_v1 = vsub.f32 %v706_v7, %v712_v62 }
 0x215   : > { %v739_v16 = vmul.f32 %v2212_v14, %v721_v10  ;;  %v719_v19 = vsub.f32 %v707_v15, %v713_v11  ;;  %v764_v24 = vadd.f32 %v1812_v20, %v751_v17 }
 0x216   : > { %v730_v18 = vadd.f32 1e-05, %v718_v1 }
 0x217   : > { %v752_v21 = vmul.f32 %v1811_v8, %v739_v16  ;;  %v731_v22 = vadd.f32 1e-05, %v719_v19 }
 0x218   : > { %2217 = vrsqrt.f32 %v730_v18 }
 0x219   : > { %v765_v2 = vadd.f32 %v1812_v20, %v752_v21  ;;  %2219 = vrsqrt.f32 %v731_v22 }
 0x21a   : > { %v2214_v25 = vpop.eup %2213 }
 0x21b   : > { %v770_v27 = vpack.c.bf16 %v765_v2, %v764_v24  ;;  %v740_v28 = vmul.f32 %v2214_v25, %v722_v23  ;;  %v2216_v29 = vpop.eup %2215 }
 0x21c   : > { %v741_v30 = vmul.f32 %v2216_v29, %v723_v26 }
 0x21d   : > { %1927 = vmatmul.mubr.bf16.vlgmr.msra.gmra.mrb[0].mxu0 %v770_v27  ;;  %1955 = vmatmul.mubr.bf16.vlgmr.msra.gmra.mrb[0].mxu1 %v770_v27  ;;  %v753_v31 = vmul.f32 %v1811_v8, %v740_v28 }
 0x21e   : > { %1930 = vmatprep.mubr.msk.bf16.mxu0 %vm2664_vm0, %v2663_v0  ;;  %1958 = vmatprep.mubr.msk.bf16.mxu1 %vm2664_vm0, %v2663_v0  ;;  %v754_v32 = vmul.f32 %v1811_v8, %v741_v30 }
 0x21f   : > { %v766_v34 = vadd.f32 %v1812_v20, %v753_v31  ;;  %1967 = vmatpush3.bf16.msra.mxu0 %v2201_v43 }
 0x220   : > { %v767_v6 = vadd.f32 %v1812_v20, %v754_v32  ;;  %1968 = vmatprep.subr.bf16.mxu0 %v2663_v0 }
 0x222   : > { %v2218_v35 = vpop.eup %2217  ;;  %v771_v36 = vpack.c.bf16 %v767_v6, %v766_v34 }
 0x223   : > { %v742_v37 = vmul.f32 %v2218_v35, %v724_v5  ;;  %v2220_v38 = vpop.eup %2219  ;;  %1969 = vmatpush3.bf16.msra.mxu0 %v2202_v44  ;;  %v1074_v35 = vstv %s1832_s6  ;;  %s2483_s6 = scalar_lea.vmem %s3473_s5, 256 }
 0x224   : > { %v743_v39 = vmul.f32 %v2220_v38, %v725_v33  ;;  %1970 = vmatprep.subr.bf16.mxu0 %v2663_v0  ;;  %p2484_p2 = scmp.ne.s32.totalorder %s3473_s5, %s2483_s6 }
 0x225   : > { %1931 = vmatmul.mubr.bf16.gmra.mrb[4].mxu0 %v771_v36  ;;  %1959 = vmatmul.mubr.bf16.gmra.mrb[4].mxu1 %v771_v36  ;;  %v755_v40 = vmul.f32 %v1811_v8, %v742_v37 }
 0x226   : > { %1962 = vmatprep.mubr.msk.bf16.mxu1 %vm2664_vm0, %v2663_v0  ;;  %1934 = vmatprep.mubr.msk.bf16.mxu0 %vm2664_vm0, %v2663_v0  ;;  %v756_v9 = vmul.f32 %v1811_v8, %v743_v39  ;;  %p2485_p7 = pnand %p2484_p2, %p3711_p4 }
 0x227   : > { %v768_v41 = vadd.f32 %v1812_v20, %v755_v40  ;;  %1971 = vmatpush3.bf16.msra.mxu0 %v2203_v45 }
 0x228   : > { %v769_v42 = vadd.f32 %v1812_v20, %v756_v9  ;;  %1972 = vmatprep.subr.bf16.mxu0 %v2663_v0  ;;  %v1065_v20 = vlaneseq  ;;  %p2486_p3 = pneg %p2485_p7 }
 0x22a   : > { %v772_v12 = vpack.c.bf16 %v769_v42, %v768_v41  ;;  %v1066_v26 = vshrl.u32 %v1065_v20, 7  ;;  %v3331_v42 = vld [vmem:[#allocation11] ss:$0 sm:$0xff] }
 0x22b   : > { %1973 = vmatpush3.bf16.msra.mxu0 %v2204_v46 }
 0x22c   : > { %1974 = vmatprep.subr.bf16.mxu0 %v2663_v0  ;;  %v1067_v37 = vadd.s32 8, %v1066_v26  ;;  %v1075_v39 = vadd.s32 %v1074_v35, %v1066_v26  ;;  %v1068_v44 = vadd.s32 16, %v1066_v26 }
 0x22d   : > { %1963 = vmatmul.mubr.bf16.gmra.mrb[8].mxu1 %v772_v12  ;;  %1935 = vmatmul.mubr.bf16.gmra.mrb[8].mxu0 %v772_v12 }
 0x22e   : > { %1982 = vmatprep.mubr.msk.bf16.mxu0 %vm2664_vm0, %v2663_v0  ;;  %v1076_v41 = vadd.s32 %v1074_v35, %v1067_v37  ;;  %vm1081_vm1 = vcmp.ge.s32.totalorder %v1075_v39, 0  ;;  %vm1087_vm2 = vcmp.lt.s32.totalorder %v1075_v39, 40 }
 0x22f   : > { %1975 = vmatpush3.bf16.msra.mxu0 %v2205_v47  ;;  %v1069_v47 = vadd.s32 24, %v1066_v26  ;;  %vm1093_vm5 = vmand %vm1081_vm1, %vm1087_vm2 }
 0x230   : > { %1976 = vmatprep.subr.bf16.mxu0 %v2663_v0  ;;  %vm1082_vm3 = vcmp.ge.s32.totalorder %v1076_v41, 0  ;;  %vm1088_vm4 = vcmp.lt.s32.totalorder %v1076_v41, 40 }
 0x231   : > { %vm1094_vm6 = vmand %vm1082_vm3, %vm1088_vm4 }
 0x233   : > { %1977 = vmatpush3.bf16.msra.mxu0 %v2206_v48 }
 0x234   : > { %1978 = vmatprep.subr.bf16.mxu0 %v2663_v0 }
 0x237   : > { %1979 = vmatpush3.bf16.msra.mxu0 %v2207_v49 }
 0x238   : > { %1980 = vmatprep.subr.bf16.mxu0 %v2663_v0 }
 0x23b   : > { %1981 = vmatpush3.bf16.msra.mxu0 %v2208_v50 }
 0x2f0   : > { %v3318_v52 = vpop.f32.mrb[0].mxu0  ;;  %v1006_v53 = vpop.f32.mrb[0].mxu1 }
 0x2f1   : > { %v1007_v54 = vadd.f32 %v1822_v51, %v1006_v53  ;;  %v1928_v55 = vpop.f32.mrb[1].mxu0  ;;  %v1956_v56 = vpop.f32.mrb[1].mxu1  ;;  %v879_v46 = vadd.f32 %v3331_v42, %v3318_v52 }
 0x2f2   : > { %v3320_v57 = vpop.f32.mrb[2].mxu0  ;;  %v1009_v58 = vpop.f32.mrb[2].mxu1  ;;  %v1078_v56 = vadd.s32 %v1074_v35, %v1069_v47 }
 0x2f3   : > { %v1029_v59 = vsub.f32 0.0, %v1007_v54  ;;  %v1010_v60 = vadd.f32 %v1822_v51, %v1009_v58  ;;  %v1929_v61 = vpop.f32.mrb[3].mxu0  ;;  %v1957_v62 = vpop.f32.mrb[3].mxu1  ;;  %v882_v50 = vadd.f32 %v3331_v42, %v3320_v57 }
 0x2f4   : > { %vm1084_vm9 = vcmp.ge.s32.totalorder %v1078_v56, 0  ;;  %vm1090_vm10 = vcmp.lt.s32.totalorder %v1078_v56, 40 }
 0x2f5   : > { %v1035_v63 = vmul.f32 1.442695, %v1029_v59  ;;  %v1030_v3 = vsub.f32 0.0, %v1010_v60  ;;  %v1070_v60 = vadd.s32 32, %v1066_v26  ;;  %vm1096_vm12 = vmand %vm1084_vm9, %vm1090_vm10 }
 0x2f7   : > { %2221 = vpow2.f32 %v1035_v63  ;;  %v1037_v4 = vmul.f32 1.442695, %v1030_v3  ;;  %v1071_v63 = vadd.s32 40, %v1066_v26 }
 0x2f8   : > { %v3322_v0 = vpop.f32.mrb[4].mxu0  ;;  %v1014_v7 = vpop.f32.mrb[4].mxu1 }
 0x2f9   : > { %2223 = vpow2.f32 %v1037_v4  ;;  %v1015_v8 = vadd.f32 %v1822_v51, %v1014_v7  ;;  %v1932_v10 = vpop.f32.mrb[5].mxu0  ;;  %v1960_v11 = vpop.f32.mrb[5].mxu1  ;;  %v887_v57 = vadd.f32 %v3331_v42, %v3322_v0  ;;  %v1833_v0 = vld [vmem:[%s3703_s14] ss:$0 sm:$0xff]  ;;  %s2489_s14 = scalar_lea.vmem %s2488_s16, 512 }
 0x2fa   : > { %v3324_v13 = vpop.f32.mrb[6].mxu0  ;;  %v1017_v14 = vpop.f32.mrb[6].mxu1  ;;  %p2491_p9 = scmp.lt.s32.totalorder %s2489_s14, %s2483_s6 }
 0x2fb   : > { %v1031_v1 = vsub.f32 0.0, %v1015_v8  ;;  %v1018_v15 = vadd.f32 %v1822_v51, %v1017_v14  ;;  %v1933_v16 = vpop.f32.mrb[7].mxu0  ;;  %v1961_v17 = vpop.f32.mrb[7].mxu1  ;;  %v890_v7 = vadd.f32 %v3331_v42, %v3324_v13  ;;  %v1079_v8 = vadd.s32 %v1074_v35, %v1070_v60  ;;  %v1835_v13 = vld [vmem:[%s3704_s10 + $0x2] ss:$0 sm:$0xff] }
 0x2fc   : > { %p2492_p12 = por %p2491_p9, %p2490_p6 }
 0x2fd   : > { %v1039_v18 = vmul.f32 1.442695, %v1031_v1  ;;  %v1032_v19 = vsub.f32 0.0, %v1018_v15  ;;  %v1080_v1 = vadd.s32 %v1074_v35, %v1071_v63  ;;  %v1834_v15 = vld [vmem:[%s3704_s10 + $0x1] ss:$0 sm:$0xff]  ;;  %vm1085_vm13 = vcmp.ge.s32.totalorder %v1079_v8, 0 }
 0x2fe   : > { %vm1091_vm14 = vcmp.lt.s32.totalorder %v1079_v8, 40  ;;  %p2493_p1 = pnand %p2492_p12, %p2486_p3 }
 0x2ff   : > { %2225 = vpow2.f32 %v1039_v18  ;;  %v1041_v21 = vmul.f32 1.442695, %v1032_v19  ;;  %vm1086_vm15 = vcmp.ge.s32.totalorder %v1080_v1, 0  ;;  %vm1092_vm0 = vcmp.lt.s32.totalorder %v1080_v1, 40  ;;  %vm1097_vm1 = vmand %vm1085_vm13, %vm1091_vm14 }
 0x300   : > { %v1022_v22 = vpop.f32.mrb[8].mxu1  ;;  %v3327_v23 = vpop.f32.mrb[8].mxu0  ;;  %vm3370_vm2 = vmand %vm1086_vm15, %vm1092_vm0 }
 0x301   : > { %v2222_v24 = vpop.eup %2221  ;;  %2227 = vpow2.f32 %v1041_v21  ;;  %v1023_v2 = vadd.f32 %v1822_v51, %v1022_v22  ;;  %v1964_v25 = vpop.f32.mrb[9].mxu1  ;;  %v895_v22 = vadd.f32 %v3331_v42, %v3327_v23  ;;  %v1837_v23 = vld [vmem:[%s3704_s10 + $0x4] ss:$0 sm:$0xff] }
 0x302   : > { %v1936_v27 = vpop.f32.mrb[9].mxu0  ;;  %v1047_v28 = vadd.f32 1.0, %v2222_v24  ;;  %v1025_v29 = vpop.f32.mrb[10].mxu1 }
 0x303   : > { %v3329_v30 = vpop.f32.mrb[10].mxu0  ;;  %v2224_v31 = vpop.eup %2223  ;;  %v1033_v5 = vsub.f32 0.0, %v1023_v2  ;;  %v1026_v32 = vadd.f32 %v1822_v51, %v1025_v29  ;;  %v1077_v51 = vadd.s32 %v1074_v35, %v1068_v44  ;;  %v1836_v2 = vld [vmem:[%s3704_s10 + $0x3] ss:$0 sm:$0xff]  ;;  %v1838_v35 = vld [vmem:[%s3704_s10 + $0x5] ss:$0 sm:$0xff] }
 0x304   : > { %v1937_v33 = vpop.f32.mrb[11].mxu0  ;;  %v1965_v34 = vpop.f32.mrb[11].mxu1  ;;  %2229 = vrcp.f32 %v1047_v28  ;;  %v1048_v6 = vadd.f32 1.0, %v2224_v31  ;;  %v898_v29 = vadd.f32 %v3331_v42, %v3329_v30 }
 0x305   : > { %v1043_v36 = vmul.f32 1.442695, %v1033_v5  ;;  %v1034_v38 = vsub.f32 0.0, %v1026_v32  ;;  %vm1083_vm7 = vcmp.ge.s32.totalorder %v1077_v51, 0  ;;  %vm1089_vm8 = vcmp.lt.s32.totalorder %v1077_v51, 40 }
 0x306   : > { %2231 = vrcp.f32 %v1048_v6  ;;  %vm1095_vm11 = vmand %vm1083_vm7, %vm1089_vm8  ;;  %v1840_v51 = vld [vmem:[%s3704_s10 + $0x7] ss:$0 sm:$0xff] }
 0x307   : > { %2233 = vpow2.f32 %v1043_v36  ;;  %v1045_v40 = vmul.f32 1.442695, %v1034_v38 }
 0x309   : > { %v2226_v9 = vpop.eup %2225  ;;  %2235 = vpow2.f32 %v1045_v40 }
 0x30a   : > { %v1049_v12 = vadd.f32 1.0, %v2226_v9 }
 0x30b   : > { %v2228_v43 = vpop.eup %2227 }
 0x30c   : > { %2237 = vrcp.f32 %v1049_v12  ;;  %v1050_v45 = vadd.f32 1.0, %v2228_v43 }
 0x30e   : > { %v2230_v48 = vpop.eup %2229  ;;  %2239 = vrcp.f32 %v1050_v45  ;;  %v1839_v45 = vld [vmem:[%s3704_s10 + $0x6] ss:$0 sm:$0xff] }
 0x30f   : > { %v1059_v49 = vmul.f32 %v2230_v48, %v879_v46 }
 0x310   : > { %v2232_v53 = vpop.eup %2231 }
 0x311   : > { %v2234_v54 = vpop.eup %2233  ;;  %v1060_v55 = vmul.f32 %v2232_v53, %v882_v50  ;;  %v1111_v58 = vsel %vm1093_vm5, %v1059_v49, 0.0 }
 0x312   : > { %v1051_v59 = vadd.f32 1.0, %v2234_v54  ;;  %1117 = vst [vmem:[#allocation2] sm:$0xff] %v1111_v58 }
 0x313   : > { %v2236_v52 = vpop.eup %2235  ;;  %v3337_v61 = vsel %vm1094_vm6, %v1060_v55, 0.0 }
 0x314   : > { %2241 = vrcp.f32 %v1051_v59  ;;  %1118 = vst [vmem:[#allocation2 + $0x8] sm:$0xff] %v3337_v61  ;;  %v1052_v62 = vadd.f32 1.0, %v2236_v52  ;;  %v1841_v59 = vld [vmem:[%s3704_s10 + $0x8] ss:$0 sm:$0xff] }
 0x316   : > { %v2238_v3 = vpop.eup %2237  ;;  %2243 = vrcp.f32 %v1052_v62 }
 0x317   : > { %v1061_v4 = vmul.f32 %v2238_v3, %v887_v57  ;;  %v1207_v57 = vmul.f32 %v1840_v51, %v3337_v61  ;;  %v1842_v3 = vld [vmem:[%s3704_s10 + $0x9] ss:$0 sm:$0xff]  ;;  %v1844_v61 = vld [vmem:[%s3704_s10 + $0xb] ss:$0 sm:$0xff] }
 0x318   : > { %v2240_v10 = vpop.eup %2239 }
 0x319   : > { %v1062_v11 = vmul.f32 %v2240_v10, %v890_v7  ;;  %v3344_v14 = vsel %vm1095_vm11, %v1061_v4, 0.0 }
 0x31a   : > { %1119 = vst [vmem:[#allocation2 + $0x10] sm:$0xff] %v3344_v14 }
 0x31b   : > { %v3356_v16 = vsel %vm1096_vm12, %v1062_v11, 0.0  ;;  %v1123_v17 = vld [vmem:[#allocation2 + $0x1] sm:$0xff]  ;;  %v1843_v11 = vld [vmem:[%s3704_s10 + $0xa] ss:$0 sm:$0xff] }
 0x31c   : > { %v1134_v18 = vld [vmem:[#allocation2 + $0x2] sm:$0xff]  ;;  %1120 = vst [vmem:[#allocation2 + $0x18] sm:$0xff] %v3356_v16  ;;  %v1130_v20 = vmul.f32 %v1833_v0, %v1123_v17 }
 0x31d   : > { %v1145_v19 = vld [vmem:[#allocation2 + $0x3] sm:$0xff]  ;;  %v1141_v21 = vmul.f32 %v1834_v15, %v1134_v18 }
 0x31e   : > { %v1156_v24 = vld [vmem:[#allocation2 + $0x4] sm:$0xff]  ;;  %v2242_v25 = vpop.eup %2241  ;;  %v1152_v27 = vmul.f32 %v1835_v13, %v1145_v19  ;;  %v1208_v19 = vmul.f32 %v1840_v51, %v3344_v14 }
 0x31f   : > { %v1143_v26 = vadd.f32 %v1141_v21, %v1130_v20  ;;  %v1063_v28 = vmul.f32 %v2242_v25, %v895_v22  ;;  %v1167_v31 = vld [vmem:[#allocation2 + $0x5] sm:$0xff]  ;;  %v1163_v34 = vmul.f32 %v1836_v2, %v1156_v24 }
 0x320   : > { %v2244_v5 = vpop.eup %2243  ;;  %v1178_v6 = vld [vmem:[#allocation2 + $0x6] sm:$0xff]  ;;  %v1174_v42 = vmul.f32 %v1837_v23, %v1167_v31 }
 0x321   : > { %v1154_v33 = vadd.f32 %v1152_v27, %v1143_v26  ;;  %v3377_v36 = vsel %vm1097_vm1, %v1063_v28, 0.0  ;;  %v1064_v30 = vmul.f32 %v2244_v5, %v898_v29  ;;  %v1124_v37 = vld [vmem:[#allocation2 + $0x9] sm:$0xff]  ;;  %v1185_v49 = vmul.f32 %v1838_v35, %v1178_v6 }
 0x322   : > { %v1135_v38 = vld [vmem:[#allocation2 + $0xa] sm:$0xff]  ;;  %1121 = vst [vmem:[#allocation2 + $0x20] sm:$0xff] %v3377_v36  ;;  %v1131_v40 = vmul.f32 %v1833_v0, %v1124_v37  ;;  %v1217_v10 = vmul.f32 %v1841_v59, %v1124_v37 }
 0x323   : > { %v1146_v39 = vld [vmem:[#allocation2 + $0xb] sm:$0xff]  ;;  %v1142_v9 = vmul.f32 %v1834_v15, %v1135_v38  ;;  %v1165_v41 = vadd.f32 %v1163_v34, %v1154_v33  ;;  %v1116_v12 = vsel %vm3370_vm2, %v1064_v30, 0.0  ;;  %v1231_v28 = vld [vmem:[#allocation2 + $0x13] sm:$0xff] }
 0x324   : > { %v1157_v43 = vld [vmem:[#allocation2 + $0xc] sm:$0xff]  ;;  %1122 = vst [vmem:[#allocation2 + $0x28] sm:$0xff] %v1116_v12  ;;  %v1153_v47 = vmul.f32 %v1835_v13, %v1146_v39  ;;  %v1227_v13 = vmul.f32 %v1842_v3, %v1135_v38  ;;  %v1237_v21 = vmul.f32 %v1843_v11, %v1146_v39  ;;  %v1241_v33 = vld [vmem:[#allocation2 + $0x14] sm:$0xff] }
 0x325   : > { %v1189_v44 = vld [vmem:[#allocation2 + $0x7] sm:$0xff]  ;;  %v1144_v46 = vadd.f32 %v1142_v9, %v1131_v40  ;;  %v1176_v48 = vadd.f32 %v1174_v42, %v1165_v41  ;;  %v1164_v54 = vmul.f32 %v1836_v2, %v1157_v43  ;;  %v1190_v63 = vld [vmem:[#allocation2 + $0xf] sm:$0xff]  ;;  %v1247_v27 = vmul.f32 %v1844_v61, %v1157_v43 }
 0x326   : > { %v1168_v50 = vld [vmem:[#allocation2 + $0xd] sm:$0xff]  ;;  %v1196_v56 = vmul.f32 %v1839_v45, %v1189_v44  ;;  %v1197_v0 = vmul.f32 %v1839_v45, %v1190_v63  ;;  %v1845_v24 = vld [vmem:[%s3704_s10 + $0xc] ss:$0 sm:$0xff]  ;;  %v1251_v38 = vld [vmem:[#allocation2 + $0x15] sm:$0xff]  ;;  %v1248_v9 = vmul.f32 %v1844_v61, %v1241_v33 }
 0x327   : > { %v1155_v53 = vadd.f32 %v1153_v47, %v1144_v46  ;;  %v1187_v55 = vadd.f32 %v1185_v49, %v1176_v48  ;;  %v1179_v58 = vld [vmem:[#allocation2 + $0xe] sm:$0xff]  ;;  %v1175_v60 = vmul.f32 %v1837_v23, %v1168_v50  ;;  %v1846_v29 = vld [vmem:[%s3704_s10 + $0xd] ss:$0 sm:$0xff]  ;;  %v1257_v32 = vmul.f32 %v1845_v24, %v1168_v50  ;;  %v1261_v12 = vld [vmem:[#allocation2 + $0x16] sm:$0xff] }
 0x328   : > { %v1186_v7 = vmul.f32 %v1838_v35, %v1179_v58  ;;  %v1211_v17 = vld [vmem:[#allocation2 + $0x11] sm:$0xff]  ;;  %v1847_v34 = vld [vmem:[%s3704_s10 + $0xe] ss:$0 sm:$0xff]  ;;  %v1238_v35 = vmul.f32 %v1843_v11, %v1231_v28  ;;  %v1267_v37 = vmul.f32 %v1846_v29, %v1179_v58  ;;  %v1848_v39 = vld [vmem:[%s3704_s10 + $0xf] ss:$0 sm:$0xff]  ;;  %v1258_v45 = vmul.f32 %v1845_v24, %v1251_v38 }
 0x329   : > { %v1166_v52 = vadd.f32 %v1164_v54, %v1155_v53  ;;  %v1198_v62 = vadd.f32 %v1196_v56, %v1187_v55  ;;  %v1221_v22 = vld [vmem:[#allocation2 + $0x12] sm:$0xff]  ;;  %v1218_v25 = vmul.f32 %v1841_v59, %v1211_v17  ;;  %v1277_v42 = vmul.f32 %v1847_v34, %v1190_v63  ;;  %v1849_v43 = vld [vmem:[%s3704_s10 + $0x10] ss:$0 sm:$0xff]  ;;  %v1850_v49 = vld [vmem:[%s3704_s10 + $0x11] ss:$0 sm:$0xff] }
 0x32a   : > { %v1228_v23 = vmul.f32 %v1842_v3, %v1221_v22  ;;  %v1287_v47 = vmul.f32 %v1848_v39, %v3344_v14  ;;  %v1271_v48 = vld [vmem:[#allocation2 + $0x17] sm:$0xff]  ;;  %v1268_v51 = vmul.f32 %v1846_v29, %v1261_v12  ;;  %v1297_v54 = vmul.f32 %v1849_v43, %v1211_v17  ;;  %v1851_v55 = vld [vmem:[%s3704_s10 + $0x12] ss:$0 sm:$0xff]  ;;  %v1852_v14 = vld [vmem:[%s3704_s10 + $0x13] ss:$0 sm:$0xff] }
 0x32b   : > { %v1177_v4 = vadd.f32 %v1175_v60, %v1166_v52  ;;  %v1209_v8 = vadd.f32 %v1207_v57, %v1198_v62  ;;  %v1278_v58 = vmul.f32 %v1847_v34, %v1271_v48  ;;  %v1307_v52 = vmul.f32 %v1850_v49, %v1221_v22  ;;  %v1291_v60 = vld [vmem:[#allocation2 + $0x19] sm:$0xff] }
 0x32c   : > { %v1288_v57 = vmul.f32 %v1848_v39, %v3356_v16  ;;  %v1317_v3 = vmul.f32 %v1851_v55, %v1231_v28 }
 0x32d   : > { %v1188_v1 = vadd.f32 %v1186_v7, %v1177_v4  ;;  %v1219_v15 = vadd.f32 %v1217_v10, %v1209_v8  ;;  %v1301_v4 = vld [vmem:[#allocation2 + $0x1a] sm:$0xff]  ;;  %v1853_v7 = vld [vmem:[%s3704_s10 + $0x14] ss:$0 sm:$0xff]  ;;  %v1298_v10 = vmul.f32 %v1849_v43, %v1291_v60 }
 0x32e   : > { %v1308_v17 = vmul.f32 %v1850_v49, %v1301_v4  ;;  %v1381_v49 = vld [vmem:[#allocation2 + $0x22] sm:$0xff] }
 0x32f   : > { %v1199_v18 = vadd.f32 %v1197_v0, %v1188_v1  ;;  %v1229_v20 = vadd.f32 %v1227_v13, %v1219_v15  ;;  %v1327_v1 = vmul.f32 %v1852_v14, %v1241_v33  ;;  %v1311_v0 = vld [vmem:[#allocation2 + $0x1b] sm:$0xff]  ;;  %v1854_v15 = vld [vmem:[%s3704_s10 + $0x15] ss:$0 sm:$0xff] }
 0x330   : > { %v1318_v22 = vmul.f32 %v1851_v55, %v1311_v0 }
 0x331   : > { %v1210_v2 = vadd.f32 %v1208_v19, %v1199_v18  ;;  %v1239_v26 = vadd.f32 %v1237_v21, %v1229_v20  ;;  %v1337_v18 = vmul.f32 %v1853_v7, %v1251_v38  ;;  %v1321_v19 = vld [vmem:[#allocation2 + $0x1c] sm:$0xff]  ;;  %v1855_v20 = vld [vmem:[%s3704_s10 + $0x16] ss:$0 sm:$0xff] }
 0x332   : > { %v1328_v28 = vmul.f32 %v1852_v14, %v1321_v19  ;;  %v1401_v14 = vld [vmem:[#allocation2 + $0x24] sm:$0xff] }
 0x333   : > { %v1220_v31 = vadd.f32 %v1218_v25, %v1210_v2  ;;  %v1249_v5 = vadd.f32 %v1247_v27, %v1239_v26  ;;  %v1347_v2 = vmul.f32 %v1854_v15, %v1261_v12  ;;  %v1331_v25 = vld [vmem:[#allocation2 + $0x1d] sm:$0xff]  ;;  %v1856_v26 = vld [vmem:[%s3704_s10 + $0x17] ss:$0 sm:$0xff] }
 0x334   : > { %v1338_v33 = vmul.f32 %v1853_v7, %v1331_v25  ;;  %v1411_v7 = vld [vmem:[#allocation2 + $0x25] sm:$0xff] }
 0x335   : > { %v1230_v6 = vadd.f32 %v1228_v23, %v1220_v31  ;;  %v1259_v30 = vadd.f32 %v1257_v32, %v1249_v5  ;;  %v1357_v31 = vmul.f32 %v1855_v20, %v1271_v48  ;;  %v1341_v23 = vld [vmem:[#allocation2 + $0x1e] sm:$0xff]  ;;  %v1857_v5 = vld [vmem:[%s3704_s10 + $0x18] ss:$0 sm:$0xff] }
 0x336   : > { %v1348_v38 = vmul.f32 %v1854_v15, %v1341_v23  ;;  %v1864_v15 = vld [vmem:[%s3707_s22] ss:$0 sm:$0xff] }
 0x337   : > { %v1240_v40 = vadd.f32 %v1238_v35, %v1230_v6  ;;  %v1269_v41 = vadd.f32 %v1267_v37, %v1259_v30  ;;  %v1367_v6 = vmul.f32 %v1856_v26, %v3356_v16  ;;  %v1351_v35 = vld [vmem:[#allocation2 + $0x1f] sm:$0xff]  ;;  %v1858_v30 = vld [vmem:[%s3704_s10 + $0x19] ss:$0 sm:$0xff]  ;;  %v1860_v16 = vld [vmem:[%s3704_s10 + $0x1b] ss:$0 sm:$0xff] }
 0x338   : > { %v1387_v43 = vmul.f32 %v1858_v30, %v1301_v4  ;;  %v1407_v55 = vmul.f32 %v1860_v16, %v1321_v19 }
 0x339   : > { %v1250_v44 = vadd.f32 %v1248_v9, %v1240_v40  ;;  %v1279_v46 = vadd.f32 %v1277_v42, %v1269_v41  ;;  %v1377_v40 = vmul.f32 %v1857_v5, %v1291_v60  ;;  %v1859_v9 = vld [vmem:[%s3704_s10 + $0x1a] ss:$0 sm:$0xff]  ;;  %v1358_v42 = vmul.f32 %v1855_v20, %v1351_v35 }
 0x33a   : > { %v1397_v48 = vmul.f32 %v1859_v9, %v1311_v0  ;;  %v1421_v0 = vld [vmem:[#allocation2 + $0x26] sm:$0xff] }
 0x33b   : > { %v1260_v50 = vadd.f32 %v1258_v45, %v1250_v44  ;;  %v1289_v53 = vadd.f32 %v1287_v47, %v1279_v46  ;;  %v1371_v44 = vld [vmem:[#allocation2 + $0x21] sm:$0xff]  ;;  %v1368_v46 = vmul.f32 %v1856_v26, %v3377_v36 }
 0x33d   : > { %v1270_v56 = vadd.f32 %v1268_v51, %v1260_v50  ;;  %v1299_v59 = vadd.f32 %v1297_v54, %v1289_v53  ;;  %v1861_v50 = vld [vmem:[%s3704_s10 + $0x1c] ss:$0 sm:$0xff]  ;;  %v1378_v53 = vmul.f32 %v1857_v5, %v1371_v44 }
 0x33e   : > { %v1417_v36 = vmul.f32 %v1861_v50, %v1331_v25 }
 0x33f   : > { %v1280_v62 = vadd.f32 %v1278_v58, %v1270_v56  ;;  %v1309_v63 = vadd.f32 %v1307_v52, %v1299_v59  ;;  %v1391_v56 = vld [vmem:[#allocation2 + $0x23] sm:$0xff]  ;;  %v1862_v58 = vld [vmem:[%s3704_s10 + $0x1d] ss:$0 sm:$0xff]  ;;  %v1388_v52 = vmul.f32 %v1858_v30, %v1381_v49 }
 0x340   : > { %v1427_v4 = vmul.f32 %v1862_v58, %v1341_v23  ;;  %v1428_v20 = vmul.f32 %v1862_v58, %v1421_v0 }
 0x341   : > { %v1290_v8 = vadd.f32 %v1288_v57, %v1280_v62  ;;  %v1319_v11 = vadd.f32 %v1317_v3, %v1309_v63  ;;  %v1863_v62 = vld [vmem:[%s3704_s10 + $0x1e] ss:$0 sm:$0xff]  ;;  %v1398_v63 = vmul.f32 %v1859_v9, %v1391_v56 }
 0x343   : > { %v1300_v13 = vadd.f32 %v1298_v10, %v1290_v8  ;;  %v1329_v61 = vadd.f32 %v1327_v1, %v1319_v11  ;;  %v1408_v10 = vmul.f32 %v1860_v16, %v1401_v14  ;;  %v1437_v1 = vmul.f32 %v1863_v62, %v1351_v35 }
 0x345   : > { %v1310_v21 = vadd.f32 %v1308_v17, %v1300_v13  ;;  %v1339_v24 = vadd.f32 %v1337_v18, %v1329_v61  ;;  %v1418_v17 = vmul.f32 %v1861_v50, %v1411_v7  ;;  %v1431_v18 = vld [vmem:[#allocation2 + $0x27] sm:$0xff] }
 0x347   : > { %v1320_v27 = vadd.f32 %v1318_v22, %v1310_v21  ;;  %v1349_v29 = vadd.f32 %v1347_v2, %v1339_v24  ;;  %v1438_v24 = vmul.f32 %v1863_v62, %v1431_v18 }
 0x349   : > { %v1330_v32 = vadd.f32 %v1328_v28, %v1320_v27  ;;  %v1359_v34 = vadd.f32 %v1357_v31, %v1349_v29 }
 0x34b   : > { %v1340_v37 = vadd.f32 %v1338_v33, %v1330_v32  ;;  %v1369_v39 = vadd.f32 %v1367_v6, %v1359_v34 }
 0x34d   : > { %v1350_v41 = vadd.f32 %v1348_v38, %v1340_v37  ;;  %v1379_v12 = vadd.f32 %v1377_v40, %v1369_v39  ;;  %v1865_v37 = vld [vmem:[%s3709_s29] ss:$0 sm:$0xff] }
 0x34f   : > { %v1360_v45 = vadd.f32 %v1358_v42, %v1350_v41  ;;  %v1389_v47 = vadd.f32 %v1387_v43, %v1379_v12 }
 0x351   : > { %v1370_v51 = vadd.f32 %v1368_v46, %v1360_v45  ;;  %v1399_v54 = vadd.f32 %v1397_v48, %v1389_v47 }
 0x353   : > { %v1380_v59 = vadd.f32 %v1378_v53, %v1370_v51  ;;  %v1409_v60 = vadd.f32 %v1407_v55, %v1399_v54 }
 0x355   : > { %v1390_v57 = vadd.f32 %v1388_v52, %v1380_v59  ;;  %v1419_v3 = vadd.f32 %v1417_v36, %v1409_v60 }
 0x357   : > { %v1400_v8 = vadd.f32 %v1398_v63, %v1390_v57  ;;  %v1429_v11 = vadd.f32 %v1427_v4, %v1419_v3 }
 0x359   : > { %v1410_v13 = vadd.f32 %v1408_v10, %v1400_v8  ;;  %v1439_v61 = vadd.f32 %v1437_v1, %v1429_v11 }
 0x35b   : > { %v1420_v19 = vadd.f32 %v1418_v17, %v1410_v13  ;;  %v1448_v21 = vadd.f32 %v1864_v15, %v1439_v61 }
 0x35d   : > { %v1430_v22 = vadd.f32 %v1428_v20, %v1420_v19  ;;  %v1450_v2 = vsub.f32 0.0, %v1448_v21 }
 0x35f   : > { %v1440_v25 = vadd.f32 %v1438_v24, %v1430_v22  ;;  %v1452_v26 = vmul.f32 1.442695, %v1450_v2 }
 0x361   : > { %v1449_v27 = vadd.f32 %v1864_v15, %v1440_v25  ;;  %2245 = vpow2.f32 %v1452_v26 }
 0x363   : > { %v1451_v28 = vsub.f32 0.0, %v1449_v27 }
 0x365   : > { %v1454_v29 = vmul.f32 1.442695, %v1451_v28 }
 0x367   : > { %2247 = vpow2.f32 %v1454_v29 }
 0x36b   : > { %v2246_v31 = vpop.eup %2245 }
 0x36c   : > { %v1456_v23 = vadd.f32 1.0, %v2246_v31 }
 0x36e   : > { %2249 = vrcp.f32 %v1456_v23 }
 0x371   : > { %v2248_v5 = vpop.eup %2247 }
 0x372   : > { %v1457_v32 = vadd.f32 1.0, %v2248_v5 }
 0x374   : > { %2251 = vrcp.f32 %v1457_v32 }
 0x378   : > { %v2250_v33 = vpop.eup %2249 }
 0x379   : > { %v1460_v6 = vmul.f32 %v2250_v33, %v1448_v21 }
 0x37e   : > { %v2252_v34 = vpop.eup %2251 }
 0x37f   : > { %v1461_v35 = vmul.f32 %v2252_v34, %v1449_v27 }
 0x381   : > { %v1462_v30 = vpack.c.bf16 %v1461_v35, %v1460_v6 }
 0x383   : > { %1983 = vmatmul.mubr.bf16.vlgmr.msra.gmra.mrb[12].mxu0 %v1462_v30 }
 0x456   : > { %v1568_v38 = vpop.f32.mrb[12].mxu0 }
 0x457   : > { %v1569_v39 = vadd.f32 %v1865_v37, %v1568_v38  ;;  %v1984_v40 = vpop.f32.mrb[13].mxu0 }
 0x458   : > { %v1571_v9 = vpop.f32.mrb[14].mxu0 }
 0x459   : > { %1575 = vst [vmem:[%s648_s17] sm:$0xff] %v1569_v39  ;;  %v1572_v41 = vadd.f32 %v1865_v37, %v1571_v9  ;;  %v1985_v42 = vpop.f32.mrb[15].mxu0 }
 0x45b   : > { %1576 = vst [vmem:[%s648_s17 + $0x8] sm:$0xff] %v1572_v41 }
 0x45c   : > { %2496 = shalt.err (!%p2493_p1)
}
 0x45d   : > { %s2497_s28 = scalar_lea.hbm %s3478_s24, 256  ;;  %s2501_s8 = scalar_lea.hbm %s3710_s4, 1536 }
 0x45e   : > { %p2498_p13 = scmp.ne.s32.totalorder %s3478_s24, %s2497_s28  ;;  %p2502_p10 = scmp.lt.u32.totalorder %s3478_s24, %s3710_s4 }
 0x45f   : > { %p2503_p0 = scmp.lt.u32.totalorder %s2501_s8, %s2497_s28  ;;  %p2505_p2 = scmp.lt.u32.totalorder %s2497_s28, %s3478_s24 }
 0x460   : > { %p2499_p8 = pnand %p2498_p13, %p3711_p4 }
 0x461   : > { %p2504_p5 = por %p2503_p0, %p2502_p10 }
 0x462   : > { %p2500_p11 = pneg %p2499_p8 }
 0x463   : > { %p2506_p7 = por %p2505_p2, %p2504_p5 }
 0x465   : > { %p2507_p3 = pnand %p2506_p7, %p2500_p11 }
 0x467   : > { %2510 = shalt.err (!%p2507_p3)
}
 0x468   : > { %s2666_s20 = smov 128   ;;  %s2667_s9 = smov 8  }
 0x469   : > { %2016 = dma.vmem_to_hbm [thread:$0]  (%p3711_p4), %s3473_s5, 256, %s3478_s24, %s1578_s18, %s2666_s20, %s2666_s20, %s2667_s9  }
 0x46a PF: > { %s3712_s3 = sld [smem:[#allocation29_spill]]  ;;  %p2059_p6 = scmp.ge.s32.totalorder %s2649_s21, 2 }
 0x46b   : > { %p3713_p9 = scmp.ne.s32.totalorder %s3667_s25, 0 }
 0x46d   : > { %p2045_p12 = pnand %p2059_p6, %p3713_p9 }
 0x470   : > { %s1608_s29 = sand.u32 1, %s3712_s3  }
 0x471   : > { %s1609_s17 = scalar_lea.sflag [#allocation5], %s1608_s29 }
 0x472   : > { %2592 = dma.done.wait (!%p2045_p12), %s1609_s17, 256  }
 0x473   : > { %2594 = vsyncadd (!%p2045_p12), %s1609_s17, 4294967040  ;;  %s35_s21 = sadd.s32 1, %s2649_s21   ;;  %s3715_s25 = sld [smem:[#allocation26_spill]] }
 0x474   : > { %p3509_p1 = scmp.ge.s32.totalorder %s35_s21, 8   ;;  %s3716_s26 = sld [smem:[#allocation27_spill]] }
 0x475   : > { %s3717_s28 = sld [smem:[#allocation28_spill]]  ;;  %s3718_s13 = sld [smem:[#allocation42_spill]] }
 0x476   : > { %s3719_s5 = sld [smem:[#allocation30_spill]]  ;;  %s3720_s16 = sld [smem:[#allocation43_spill]] }
 0x477   : > { %s3721_s17 = sld [smem:[#allocation33_spill]]  ;;  %s3722_s18 = sld [smem:[#allocation34_spill]] }
 0x478   : > { %s3723_s19 = sld [smem:[#allocation38_spill]]  ;;  %s3724_s20 = sld [smem:[#allocation39_spill]] }
 0x479   : > { %s3725_s27 = smov %s3743_s0  ;;  %s3726_s29 = smov %s2617_s30 }
 0x47a   : > { %s3728_s14 = smov %s2625_s15  ;;  %34 = sbr.rel (!%p3509_p1) target bundleno = 30 (0x1e), region = 161 }
 0x47b   : > { %s3727_s30 = smov %s3718_s13 }
 0x47c   : > { %s3729_s15 = smov %s3719_s5 }
 0x481   :  { %1614 = vsyncpa [#allocation4], 1 }
 0x482   :  { %1616 = vsyncpa [#allocation4 + $0x1], 1 }
 0x483   :  { %1617 = vsyncpa [#allocation7], 1 }
 0x484   :  { %1619 = vsyncpa [#allocation7 + $0x1], 1 }
 0x485   :  { %1620 = vsyncpa [#allocation10], 1 }
 0x486   :  { %1621 = vsyncpa [#allocation13], 1 }
 0x487   :  { %1622 = vsyncpa [#allocation16], 1 }
 0x488   :  { %1623 = vsyncpa [#allocation5], 1 }
 0x489   :  { %1625 = vsyncpa [#allocation5 + $0x1], 1 }

</bundles_post_ra>
